<compile_context>
chip_gen: v7x
topology: tpu7x:2x2x1
jax: 0.10.0
libtpu: 0.0.40
codegen_flags: <defaults>
</compile_context>

<pallas_src>
import functools

import jax
import jax.numpy as jnp
from jax import lax
from jax.experimental import pallas as pl
from jax.experimental.pallas import tpu as pltpu


# ----------------------------- fused Pallas kernel -----------------------------

def fused_gnn_kernel(
    # graph inputs
    nodes_in_ref, ea_ref, oh_both_ref, scomb_ref,
    # packed weights
    w0_ref, w_d2d_ref, w_2d2d_ref, wf2_ref, bias_ref,
    # output
    out_ref,
    *, num_iterations, n_nodes, n_edges, dim,
):
    f32 = jnp.float32
    N, E, D = n_nodes, n_edges, dim

    def mm(a, b):
        return jnp.dot(a, b, preferred_element_type=f32)

    def mm_t(a, b):
        # a^T @ b via dot_general contracting axis 0 of both (scatter-sum over edges)
        return lax.dot_general(a, b, (((0,), (0,)), ((), ())),
                               preferred_element_type=f32)

    # ---- unpack packed weights (static slices; loaded once, stay resident) ----
    w_d2d = w_d2d_ref[...]                                  # [4D, 2D]
    w1_dst, w1_src = w_d2d[0:D], w_d2d[D:2 * D]
    wf1_n, wconv = w_d2d[2 * D:3 * D], w_d2d[3 * D:4 * D]
    w_2d2d = w_2d2d_ref[...]                                # [6D, 2D]
    w2_bd, wbp, wcp = w_2d2d[0:2 * D], w_2d2d[2 * D:4 * D], w_2d2d[4 * D:6 * D]
    wf2 = wf2_ref[...]                                      # [2D, D]
    bias = bias_ref[...]                                    # [8, 2D]
    b0, w_eff, b_eff = bias[0:1, :D], bias[1:2], bias[2:3]
    b2, bf1, bf2, bconv = bias[3:4], bias[4:5], bias[5:6, :D], bias[6:7]

    oh_both = oh_both_ref[...]          # [2E, N] rows: [one_hot(dst) ; one_hot(src)]
    scomb = scomb_ref[...]              # [E, 2N] cols: [oh_dst*deg_inv | oh_src*deg_inv]

    # ---- initial_encoder: Linear(input_shape, D) ----
    nodes0 = mm(nodes_in_ref[...], w0_ref[...]) + b0                    # [N, D]
    # ---- edge_encoder folded into first message-MLP layer: loop-invariant ----
    edge_h = ea_ref[...] * w_eff + b_eff                                # [E, 2D]

    def body(_, nodes):
        # gather x_dst / x_src with one stacked one-hot matmul (deduped gathers)
        xg = mm(oh_both, nodes)                                         # [2E, D]
        x_dst, x_src = xg[:E], xg[E:]
        # fused parent|child message MLP, concat-free (split-weight accumulation):
        #   cols [:D]  = parent: mlp(cat([x_dst, x_src, edge_enc]))
        #   cols [D:]  = child : mlp(cat([x_src, x_dst, edge_enc]))
        h = jnp.maximum(mm(x_dst, w1_dst) + mm(x_src, w1_src) + edge_h, 0.0)
        msg = mm(h, w2_bd) + b2                                         # [E, 2D]
        # combined deg-scaled scatter-sum: rows [:N] -> dst-aggregation (parent/fi),
        # rows [N:] -> src-aggregation (child/fo); 1/deg(edge_index[0]) pre-folded.
        ab = mm_t(scomb, msg)                                           # [2N, 2D]
        # Final_Agg_edges on cat([nodes, fi, fo]) done concat-free with split /
        # zero-padded weight blocks (wbp selects fi columns, wcp selects fo columns)
        hf = jnp.maximum(mm(nodes, wf1_n) + mm(ab[:N], wbp)
                         + mm(ab[N:], wcp) + bf1, 0.0)                  # [N, 2D]
        return nodes + mm(hf, wf2) + bf2                                # residual

    nodes = lax.fori_loop(0, num_iterations, body, nodes0, unroll=True)

    # ---- Conv1d(D, 2D, 1) == per-node Linear, then cat([max pool, mean pool]) ----
    y = mm(nodes, wconv) + bconv                                        # [N, 2D]
    out_ref[...] = jnp.concatenate(
        [jnp.max(y, axis=0, keepdims=True),
         jnp.mean(y, axis=0, keepdims=True)], axis=1)                   # [1, 4D]


# ----------------------------- pallas_call wrapper -----------------------------

def message_passing_gnn_edges_forward(params, nodes_in, edge_index, edge_attr,
                                      num_iterations):
    f32 = jnp.float32
    N = nodes_in.shape[0]
    D = params["W0"].shape[1]
    E = edge_attr.shape[0]
    src, dst = edge_index[0], edge_index[1]

    # ---- host-side glue: gather/scatter one-hots + degree normalisation ----
    oh_src = jax.nn.one_hot(src, N, dtype=f32)                          # [E, N]
    oh_dst = jax.nn.one_hot(dst, N, dtype=f32)                          # [E, N]
    deg = jnp.sum(oh_src, axis=0)                                       # deg(edge_index[0])
    deg_inv = jnp.where(deg > 0, 1.0 / jnp.maximum(deg, 1.0), 0.0).reshape(1, N)
    oh_both = jnp.concatenate([oh_dst, oh_src], axis=0)                 # [2E, N]
    scomb = jnp.concatenate([oh_dst * deg_inv, oh_src * deg_inv], axis=1)  # [E, 2N]
    ea = edge_attr.astype(f32).reshape(E, 1)                            # [E, 1]

    # ---- host-side weight packing (exact algebraic refactors of the layers) ----
    Wp1, Wc1 = params["Wp1"], params["Wc1"]
    # parent: cat([x_dst, x_src, ee]); child: cat([x_src, x_dst, ee])
    W1_dst = jnp.concatenate([Wp1[:D], Wc1[D:2 * D]], axis=1)           # [D, 2D]
    W1_src = jnp.concatenate([Wp1[D:2 * D], Wc1[:D]], axis=1)           # [D, 2D]
    W1_edge = jnp.concatenate([Wp1[2 * D:], Wc1[2 * D:]], axis=1)       # [D, 2D]
    b1 = jnp.concatenate([params["bp1"], params["bc1"]], axis=1)        # [1, 2D]
    # fold edge_encoder Linear(1, D) into the loop-invariant edge contribution
    w_eff = params["We"] @ W1_edge                                      # [1, 2D]
    b_eff = params["be"] @ W1_edge + b1                                 # [1, 2D]
    # block-diagonal second layer for the fused parent|child message MLP
    zDD = jnp.zeros((D, D), f32)
    W2_bd = jnp.concatenate(
        [jnp.concatenate([params["Wp2"], zDD], axis=1),
         jnp.concatenate([zDD, params["Wc2"]], axis=1)], axis=0)        # [2D, 2D]
    b2 = jnp.concatenate([params["bp2"], params["bc2"]], axis=1)        # [1, 2D]
    # Final_Agg first layer split into nodes / fi / fo blocks; fi/fo blocks are
    # zero-padded so they can be applied directly to the combined scatter output.
    Wf1 = params["Wf1"]
    Wf1_n, Wf1_i, Wf1_o = Wf1[:D], Wf1[D:2 * D], Wf1[2 * D:]
    z2 = jnp.zeros((D, 2 * D), f32)
    Wbp = jnp.concatenate([Wf1_i, z2], axis=0)                          # [2D, 2D]
    Wcp = jnp.concatenate([z2, Wf1_o], axis=0)                          # [2D, 2D]
    # sublane-stack same-shaped matrices / pack biases -> fewer HBM->VMEM DMAs
    w_d2d = jnp.concatenate([W1_dst, W1_src, Wf1_n, params["Wconv"]], axis=0)   # [4D, 2D]
    w_2d2d = jnp.concatenate([W2_bd, Wbp, Wcp], axis=0)                         # [6D, 2D]
    zD = jnp.zeros((1, D), f32)
    bias_pack = jnp.concatenate([
        jnp.concatenate([params["b0"], zD], axis=1),    # row 0: b0   (lane-padded)
        w_eff,                                          # row 1: folded edge weight
        b_eff,                                          # row 2: folded edge bias
        b2,                                             # row 3
        params["bf1"],                                  # row 4
        jnp.concatenate([params["bf2"], zD], axis=1),   # row 5: bf2  (lane-padded)
        params["bconv"],                                # row 6
        jnp.zeros((1, 2 * D), f32),                     # row 7: sublane pad
    ], axis=0)                                          # [8, 2D]

    kernel = functools.partial(fused_gnn_kernel, num_iterations=num_iterations,
                               n_nodes=N, n_edges=E, dim=D)
    vmem = lambda: pl.BlockSpec(memory_space=pltpu.MemorySpace.VMEM)

    return pl.pallas_call(
        kernel,
        out_shape=jax.ShapeDtypeStruct((1, 4 * D), jnp.float32),
        in_specs=[vmem() for _ in range(9)],
        out_specs=vmem(),
    )(
        nodes_in.astype(f32), ea, oh_both, scomb,
        params["W0"], w_d2d, w_2d2d, params["Wf2"], bias_pack,
    )


# ----------------------------- params -----------------------------

def init_params(key, input_shape, D):
    ks = jax.random.split(key, 18)
    s = 0.1

    def w(k, shape):
        return (s * jax.random.normal(k, shape)).astype(jnp.float32)

    p = {}
    # initial_encoder: Linear(input_shape, D)
    p["W0"], p["b0"] = w(ks[0], (input_shape, D)), w(ks[1], (1, D))
    # edge_encoder: Linear(1, D)
    p["We"], p["be"] = w(ks[2], (1, D)), w(ks[3], (1, D))
    # parent_agg mlp: Linear(3D, D) (merged rows: [x_i | x_j | edge]), Linear(D, D)
    p["Wp1"], p["bp1"] = w(ks[4], (3 * D, D)), w(ks[5], (1, D))
    p["Wp2"], p["bp2"] = w(ks[6], (D, D)), w(ks[7], (1, D))
    # child_agg mlp: Linear(3D, D) (merged), Linear(D, D)
    p["Wc1"], p["bc1"] = w(ks[8], (3 * D, D)), w(ks[9], (1, D))
    p["Wc2"], p["bc2"] = w(ks[10], (D, D)), w(ks[11], (1, D))
    # final_agg: Linear(3D, 2D) (merged rows: [nodes | fi | fo]), Linear(2D, D)
    p["Wf1"], p["bf1"] = w(ks[12], (3 * D, 2 * D)), w(ks[13], (1, 2 * D))
    p["Wf2"], p["bf2"] = w(ks[14], (2 * D, D)), w(ks[15], (1, D))
    # conv1: Conv1d(D, 2D, 1) == Linear(D, 2D)
    p["Wconv"], p["bconv"] = w(ks[16], (D, 2 * D)), w(ks[17], (1, 2 * D))
    return p


# ----------------------------- main -----------------------------

if __name__ == "__main__":
    N, E = 32, 64                 # nodes, edges
    INPUT_SHAPE, EMBED = 16, 32   # input feature size, embedding_dim
    NUM_ITERS = 2

    key = jax.random.PRNGKey(0)
    k_nodes, k_src, k_dst, k_ea, k_params = jax.random.split(key, 5)

    nodes_in = jax.random.normal(k_nodes, (N, INPUT_SHAPE), dtype=jnp.float32)
    src = jax.random.randint(k_src, (E,), 0, N)
    dst = jax.random.randint(k_dst, (E,), 0, N)
    edge_index = jnp.stack([src, dst], axis=0)             # [2, E]
    edge_attr = jax.random.normal(k_ea, (E,), dtype=jnp.float32)

    params = init_params(k_params, INPUT_SHAPE, EMBED)

    fwd = jax.jit(functools.partial(message_passing_gnn_edges_forward,
                                    num_iterations=NUM_ITERS))
    out = fwd(params, nodes_in, edge_index, edge_attr)
    out = jax.block_until_ready(out)
    assert out.shape == (1, 4 * EMBED), out.shape
    assert bool(jnp.all(jnp.isfinite(out)))
    print("KERNEL_OK")
</pallas_src>

<mosaic_0001>
module attributes {stable_mosaic.version = 11 : i64} {
  func.func @fused_gnn_kernel(%arg0: memref<32x16xf32, #tpu.memory_space<vmem>>, %arg1: memref<64x1xf32, #tpu.memory_space<vmem>>, %arg2: memref<128x32xf32, #tpu.memory_space<vmem>>, %arg3: memref<64x64xf32, #tpu.memory_space<vmem>>, %arg4: memref<16x32xf32, #tpu.memory_space<vmem>>, %arg5: memref<128x64xf32, #tpu.memory_space<vmem>>, %arg6: memref<192x64xf32, #tpu.memory_space<vmem>>, %arg7: memref<64x32xf32, #tpu.memory_space<vmem>>, %arg8: memref<8x64xf32, #tpu.memory_space<vmem>>, %arg9: memref<1x128xf32, #tpu.memory_space<vmem>>) attributes {dimension_semantics = [], scalar_prefetch = 0 : i64, scratch_operands = 0 : i64, tpu.core_type = #tpu.core_type<tc>} {
    %c0 = arith.constant 0 : index
    %c0_0 = arith.constant 0 : index
    %0 = vector.load %arg5[%c0, %c0_0] : memref<128x64xf32, #tpu.memory_space<vmem>>, vector<128x64xf32>
    %1 = vector.extract_strided_slice %0 {offsets = [0, 0], sizes = [32, 64], strides = [1, 1]} : vector<128x64xf32> to vector<32x64xf32>
    %2 = vector.extract_strided_slice %0 {offsets = [32, 0], sizes = [32, 64], strides = [1, 1]} : vector<128x64xf32> to vector<32x64xf32>
    %3 = vector.extract_strided_slice %0 {offsets = [64, 0], sizes = [32, 64], strides = [1, 1]} : vector<128x64xf32> to vector<32x64xf32>
    %4 = vector.extract_strided_slice %0 {offsets = [96, 0], sizes = [32, 64], strides = [1, 1]} : vector<128x64xf32> to vector<32x64xf32>
    %c0_1 = arith.constant 0 : index
    %c0_2 = arith.constant 0 : index
    %5 = vector.load %arg6[%c0_1, %c0_2] : memref<192x64xf32, #tpu.memory_space<vmem>>, vector<192x64xf32>
    %6 = vector.extract_strided_slice %5 {offsets = [0, 0], sizes = [64, 64], strides = [1, 1]} : vector<192x64xf32> to vector<64x64xf32>
    %7 = vector.extract_strided_slice %5 {offsets = [64, 0], sizes = [64, 64], strides = [1, 1]} : vector<192x64xf32> to vector<64x64xf32>
    %8 = vector.extract_strided_slice %5 {offsets = [128, 0], sizes = [64, 64], strides = [1, 1]} : vector<192x64xf32> to vector<64x64xf32>
    %c0_3 = arith.constant 0 : index
    %c0_4 = arith.constant 0 : index
    %9 = vector.load %arg7[%c0_3, %c0_4] : memref<64x32xf32, #tpu.memory_space<vmem>>, vector<64x32xf32>
    %c0_5 = arith.constant 0 : index
    %c0_6 = arith.constant 0 : index
    %10 = vector.load %arg8[%c0_5, %c0_6] : memref<8x64xf32, #tpu.memory_space<vmem>>, vector<8x64xf32>
    %11 = vector.extract_strided_slice %10 {offsets = [0, 0], sizes = [1, 32], strides = [1, 1]} : vector<8x64xf32> to vector<1x32xf32>
    %12 = vector.extract_strided_slice %10 {offsets = [1, 0], sizes = [1, 64], strides = [1, 1]} : vector<8x64xf32> to vector<1x64xf32>
    %13 = vector.extract_strided_slice %10 {offsets = [2, 0], sizes = [1, 64], strides = [1, 1]} : vector<8x64xf32> to vector<1x64xf32>
    %14 = vector.extract_strided_slice %10 {offsets = [3, 0], sizes = [1, 64], strides = [1, 1]} : vector<8x64xf32> to vector<1x64xf32>
    %15 = vector.extract_strided_slice %10 {offsets = [4, 0], sizes = [1, 64], strides = [1, 1]} : vector<8x64xf32> to vector<1x64xf32>
    %16 = vector.extract_strided_slice %10 {offsets = [5, 0], sizes = [1, 32], strides = [1, 1]} : vector<8x64xf32> to vector<1x32xf32>
    %17 = vector.extract_strided_slice %10 {offsets = [6, 0], sizes = [1, 64], strides = [1, 1]} : vector<8x64xf32> to vector<1x64xf32>
    %c0_7 = arith.constant 0 : index
    %c0_8 = arith.constant 0 : index
    %18 = vector.load %arg2[%c0_7, %c0_8] : memref<128x32xf32, #tpu.memory_space<vmem>>, vector<128x32xf32>
    %c0_9 = arith.constant 0 : index
    %c0_10 = arith.constant 0 : index
    %19 = vector.load %arg3[%c0_9, %c0_10] : memref<64x64xf32, #tpu.memory_space<vmem>>, vector<64x64xf32>
    %c0_11 = arith.constant 0 : index
    %c0_12 = arith.constant 0 : index
    %20 = vector.load %arg0[%c0_11, %c0_12] : memref<32x16xf32, #tpu.memory_space<vmem>>, vector<32x16xf32>
    %c0_13 = arith.constant 0 : index
    %c0_14 = arith.constant 0 : index
    %21 = vector.load %arg4[%c0_13, %c0_14] : memref<16x32xf32, #tpu.memory_space<vmem>>, vector<16x32xf32>
    %cst = arith.constant dense<0.000000e+00> : vector<32x32xf32>
    %22 = tpu.matmul %20, %21, %cst {dimension_numbers = #tpu.dot_dimension_numbers<[1], [0], [0], [1], [0, 0, 1, 1], [], []>} : vector<32x16xf32>, vector<16x32xf32>, vector<32x32xf32> -> vector<32x32xf32>
    %23 = vector.broadcast %11 : vector<1x32xf32> to vector<32x32xf32>
    %24 = arith.addf %22, %23 : vector<32x32xf32>
    %c0_15 = arith.constant 0 : index
    %c0_16 = arith.constant 0 : index
    %25 = vector.load %arg1[%c0_15, %c0_16] : memref<64x1xf32, #tpu.memory_space<vmem>>, vector<64x1xf32>
    %26 = vector.broadcast %25 : vector<64x1xf32> to vector<64x64xf32>
    %27 = vector.broadcast %12 : vector<1x64xf32> to vector<64x64xf32>
    %28 = arith.mulf %26, %27 : vector<64x64xf32>
    %29 = vector.broadcast %13 : vector<1x64xf32> to vector<64x64xf32>
    %30 = arith.addf %28, %29 : vector<64x64xf32>
    %c0_i32 = arith.constant 0 : i32
    %cst_17 = arith.constant dense<0.000000e+00> : vector<128x32xf32>
    %31 = tpu.matmul %18, %24, %cst_17 {dimension_numbers = #tpu.dot_dimension_numbers<[1], [0], [0], [1], [0, 0, 1, 1], [], []>} : vector<128x32xf32>, vector<32x32xf32>, vector<128x32xf32> -> vector<128x32xf32>
    %32 = vector.extract_strided_slice %31 {offsets = [0, 0], sizes = [64, 32], strides = [1, 1]} : vector<128x32xf32> to vector<64x32xf32>
    %33 = vector.extract_strided_slice %31 {offsets = [64, 0], sizes = [64, 32], strides = [1, 1]} : vector<128x32xf32> to vector<64x32xf32>
    %cst_18 = arith.constant dense<0.000000e+00> : vector<64x64xf32>
    %34 = tpu.matmul %32, %1, %cst_18 {dimension_numbers = #tpu.dot_dimension_numbers<[1], [0], [0], [1], [0, 0, 1, 1], [], []>} : vector<64x32xf32>, vector<32x64xf32>, vector<64x64xf32> -> vector<64x64xf32>
    %cst_19 = arith.constant dense<0.000000e+00> : vector<64x64xf32>
    %35 = tpu.matmul %33, %2, %cst_19 {dimension_numbers = #tpu.dot_dimension_numbers<[1], [0], [0], [1], [0, 0, 1, 1], [], []>} : vector<64x32xf32>, vector<32x64xf32>, vector<64x64xf32> -> vector<64x64xf32>
    %36 = arith.addf %34, %35 : vector<64x64xf32>
    %37 = arith.addf %36, %30 : vector<64x64xf32>
    %cst_20 = arith.constant 0.000000e+00 : f32
    %38 = vector.broadcast %cst_20 : f32 to vector<64x64xf32>
    %39 = arith.maximumf %37, %38 : vector<64x64xf32>
    %cst_21 = arith.constant dense<0.000000e+00> : vector<64x64xf32>
    %40 = tpu.matmul %39, %6, %cst_21 {dimension_numbers = #tpu.dot_dimension_numbers<[1], [0], [0], [1], [0, 0, 1, 1], [], []>} : vector<64x64xf32>, vector<64x64xf32>, vector<64x64xf32> -> vector<64x64xf32>
    %41 = vector.broadcast %14 : vector<1x64xf32> to vector<64x64xf32>
    %42 = arith.addf %40, %41 : vector<64x64xf32>
    %cst_22 = arith.constant dense<0.000000e+00> : vector<64x64xf32>
    %43 = tpu.matmul %19, %42, %cst_22 {dimension_numbers = #tpu.dot_dimension_numbers<[0], [0], [1], [1], [0, 1, 1, 1], [], []>} : vector<64x64xf32>, vector<64x64xf32>, vector<64x64xf32> -> vector<64x64xf32>
    %cst_23 = arith.constant dense<0.000000e+00> : vector<32x64xf32>
    %44 = tpu.matmul %24, %3, %cst_23 {dimension_numbers = #tpu.dot_dimension_numbers<[1], [0], [0], [1], [0, 0, 1, 1], [], []>} : vector<32x32xf32>, vector<32x64xf32>, vector<32x64xf32> -> vector<32x64xf32>
    %45 = vector.extract_strided_slice %43 {offsets = [0, 0], sizes = [32, 64], strides = [1, 1]} : vector<64x64xf32> to vector<32x64xf32>
    %cst_24 = arith.constant dense<0.000000e+00> : vector<32x64xf32>
    %46 = tpu.matmul %45, %7, %cst_24 {dimension_numbers = #tpu.dot_dimension_numbers<[1], [0], [0], [1], [0, 0, 1, 1], [], []>} : vector<32x64xf32>, vector<64x64xf32>, vector<32x64xf32> -> vector<32x64xf32>
    %47 = arith.addf %44, %46 : vector<32x64xf32>
    %48 = vector.extract_strided_slice %43 {offsets = [32, 0], sizes = [32, 64], strides = [1, 1]} : vector<64x64xf32> to vector<32x64xf32>
    %cst_25 = arith.constant dense<0.000000e+00> : vector<32x64xf32>
    %49 = tpu.matmul %48, %8, %cst_25 {dimension_numbers = #tpu.dot_dimension_numbers<[1], [0], [0], [1], [0, 0, 1, 1], [], []>} : vector<32x64xf32>, vector<64x64xf32>, vector<32x64xf32> -> vector<32x64xf32>
    %50 = arith.addf %47, %49 : vector<32x64xf32>
    %51 = vector.broadcast %15 : vector<1x64xf32> to vector<32x64xf32>
    %52 = arith.addf %50, %51 : vector<32x64xf32>
    %cst_26 = arith.constant 0.000000e+00 : f32
    %53 = vector.broadcast %cst_26 : f32 to vector<32x64xf32>
    %54 = arith.maximumf %52, %53 : vector<32x64xf32>
    %cst_27 = arith.constant dense<0.000000e+00> : vector<32x32xf32>
    %55 = tpu.matmul %54, %9, %cst_27 {dimension_numbers = #tpu.dot_dimension_numbers<[1], [0], [0], [1], [0, 0, 1, 1], [], []>} : vector<32x64xf32>, vector<64x32xf32>, vector<32x32xf32> -> vector<32x32xf32>
    %56 = arith.addf %24, %55 : vector<32x32xf32>
    %57 = vector.broadcast %16 : vector<1x32xf32> to vector<32x32xf32>
    %58 = arith.addf %56, %57 : vector<32x32xf32>
    %c1_i32 = arith.constant 1 : i32
    %cst_28 = arith.constant dense<0.000000e+00> : vector<128x32xf32>
    %59 = tpu.matmul %18, %58, %cst_28 {dimension_numbers = #tpu.dot_dimension_numbers<[1], [0], [0], [1], [0, 0, 1, 1], [], []>} : vector<128x32xf32>, vector<32x32xf32>, vector<128x32xf32> -> vector<128x32xf32>
    %60 = vector.extract_strided_slice %59 {offsets = [0, 0], sizes = [64, 32], strides = [1, 1]} : vector<128x32xf32> to vector<64x32xf32>
    %61 = vector.extract_strided_slice %59 {offsets = [64, 0], sizes = [64, 32], strides = [1, 1]} : vector<128x32xf32> to vector<64x32xf32>
    %cst_29 = arith.constant dense<0.000000e+00> : vector<64x64xf32>
    %62 = tpu.matmul %60, %1, %cst_29 {dimension_numbers = #tpu.dot_dimension_numbers<[1], [0], [0], [1], [0, 0, 1, 1], [], []>} : vector<64x32xf32>, vector<32x64xf32>, vector<64x64xf32> -> vector<64x64xf32>
    %cst_30 = arith.constant dense<0.000000e+00> : vector<64x64xf32>
    %63 = tpu.matmul %61, %2, %cst_30 {dimension_numbers = #tpu.dot_dimension_numbers<[1], [0], [0], [1], [0, 0, 1, 1], [], []>} : vector<64x32xf32>, vector<32x64xf32>, vector<64x64xf32> -> vector<64x64xf32>
    %64 = arith.addf %62, %63 : vector<64x64xf32>
    %65 = arith.addf %64, %30 : vector<64x64xf32>
    %cst_31 = arith.constant 0.000000e+00 : f32
    %66 = vector.broadcast %cst_31 : f32 to vector<64x64xf32>
    %67 = arith.maximumf %65, %66 : vector<64x64xf32>
    %cst_32 = arith.constant dense<0.000000e+00> : vector<64x64xf32>
    %68 = tpu.matmul %67, %6, %cst_32 {dimension_numbers = #tpu.dot_dimension_numbers<[1], [0], [0], [1], [0, 0, 1, 1], [], []>} : vector<64x64xf32>, vector<64x64xf32>, vector<64x64xf32> -> vector<64x64xf32>
    %69 = vector.broadcast %14 : vector<1x64xf32> to vector<64x64xf32>
    %70 = arith.addf %68, %69 : vector<64x64xf32>
    %cst_33 = arith.constant dense<0.000000e+00> : vector<64x64xf32>
    %71 = tpu.matmul %19, %70, %cst_33 {dimension_numbers = #tpu.dot_dimension_numbers<[0], [0], [1], [1], [0, 1, 1, 1], [], []>} : vector<64x64xf32>, vector<64x64xf32>, vector<64x64xf32> -> vector<64x64xf32>
    %cst_34 = arith.constant dense<0.000000e+00> : vector<32x64xf32>
    %72 = tpu.matmul %58, %3, %cst_34 {dimension_numbers = #tpu.dot_dimension_numbers<[1], [0], [0], [1], [0, 0, 1, 1], [], []>} : vector<32x32xf32>, vector<32x64xf32>, vector<32x64xf32> -> vector<32x64xf32>
    %73 = vector.extract_strided_slice %71 {offsets = [0, 0], sizes = [32, 64], strides = [1, 1]} : vector<64x64xf32> to vector<32x64xf32>
    %cst_35 = arith.constant dense<0.000000e+00> : vector<32x64xf32>
    %74 = tpu.matmul %73, %7, %cst_35 {dimension_numbers = #tpu.dot_dimension_numbers<[1], [0], [0], [1], [0, 0, 1, 1], [], []>} : vector<32x64xf32>, vector<64x64xf32>, vector<32x64xf32> -> vector<32x64xf32>
    %75 = arith.addf %72, %74 : vector<32x64xf32>
    %76 = vector.extract_strided_slice %71 {offsets = [32, 0], sizes = [32, 64], strides = [1, 1]} : vector<64x64xf32> to vector<32x64xf32>
    %cst_36 = arith.constant dense<0.000000e+00> : vector<32x64xf32>
    %77 = tpu.matmul %76, %8, %cst_36 {dimension_numbers = #tpu.dot_dimension_numbers<[1], [0], [0], [1], [0, 0, 1, 1], [], []>} : vector<32x64xf32>, vector<64x64xf32>, vector<32x64xf32> -> vector<32x64xf32>
    %78 = arith.addf %75, %77 : vector<32x64xf32>
    %79 = vector.broadcast %15 : vector<1x64xf32> to vector<32x64xf32>
    %80 = arith.addf %78, %79 : vector<32x64xf32>
    %cst_37 = arith.constant 0.000000e+00 : f32
    %81 = vector.broadcast %cst_37 : f32 to vector<32x64xf32>
    %82 = arith.maximumf %80, %81 : vector<32x64xf32>
    %cst_38 = arith.constant dense<0.000000e+00> : vector<32x32xf32>
    %83 = tpu.matmul %82, %9, %cst_38 {dimension_numbers = #tpu.dot_dimension_numbers<[1], [0], [0], [1], [0, 0, 1, 1], [], []>} : vector<32x64xf32>, vector<64x32xf32>, vector<32x32xf32> -> vector<32x32xf32>
    %84 = arith.addf %58, %83 : vector<32x32xf32>
    %85 = vector.broadcast %16 : vector<1x32xf32> to vector<32x32xf32>
    %86 = arith.addf %84, %85 : vector<32x32xf32>
    %cst_39 = arith.constant dense<0.000000e+00> : vector<32x64xf32>
    %87 = tpu.matmul %86, %4, %cst_39 {dimension_numbers = #tpu.dot_dimension_numbers<[1], [0], [0], [1], [0, 0, 1, 1], [], []>} : vector<32x32xf32>, vector<32x64xf32>, vector<32x64xf32> -> vector<32x64xf32>
    %88 = vector.broadcast %17 : vector<1x64xf32> to vector<32x64xf32>
    %89 = arith.addf %87, %88 : vector<32x64xf32>
    %cst_40 = arith.constant dense<0xFF800000> : vector<64xf32>
    %90 = vector.multi_reduction <maximumf>, %89, %cst_40 [0] : vector<32x64xf32> to vector<64xf32>
    %91 = vector.shape_cast %90 : vector<64xf32> to vector<1x64xf32>
    %cst_41 = arith.constant dense<0.000000e+00> : vector<64xf32>
    %92 = vector.multi_reduction <add>, %89, %cst_41 [0] : vector<32x64xf32> to vector<64xf32>
    %93 = vector.shape_cast %92 : vector<64xf32> to vector<1x64xf32>
    %cst_42 = arith.constant 3.200000e+01 : f32
    %94 = vector.broadcast %cst_42 : f32 to vector<1x64xf32>
    %95 = arith.divf %93, %94 : vector<1x64xf32>
    %96 = tpu.concatenate %91, %95 in 1 : vector<1x64xf32>, vector<1x64xf32> -> vector<1x128xf32>
    %c0_43 = arith.constant 0 : index
    %c0_44 = arith.constant 0 : index
    %97 = vector.load %arg9[%c0_43, %c0_44] : memref<1x128xf32, #tpu.memory_space<vmem>>, vector<1x128xf32>
    tpu.vector_store %arg9[%c0_43, %c0_44], %96 {strides = array<i32>} : memref<1x128xf32, #tpu.memory_space<vmem>>, vector<1x128xf32>,
    return
  }
}

</mosaic_0001>

<bundles_post_ra>
// kernel: message_passing_gnn_edges_forward.1
= control target key start
LH: loop header
LB: loop body
LE: loop exit
PB: predicated region body
PF: predicated region fallthrough
CT: control target
= control target key end

     0   :  { %vm116_vm0 = vcmask 130048   ;;  %s4629_s0 = inlined_call_operand.vmem [shape: f32[32,16], index: 0, kind: input, shape index: {}]   ;;  %s4630_s1 = inlined_call_operand.vmem [shape: f32[64,1], index: 1, kind: input, shape index: {}]   ;;  %s4631_s2 = inlined_call_operand.vmem [shape: f32[128,32], index: 2, kind: input, shape index: {}]   ;;  %s4632_s3 = inlined_call_operand.vmem [shape: f32[64,64], index: 3, kind: input, shape index: {}]   ;;  %s4633_s4 = inlined_call_operand.vmem [shape: f32[16,32], index: 4, kind: input, shape index: {}]   ;;  %s4634_s5 = inlined_call_operand.vmem [shape: f32[128,64], index: 5, kind: input, shape index: {}]   ;;  %s4635_s6 = inlined_call_operand.vmem [shape: f32[192,64], index: 6, kind: input, shape index: {}]   ;;  %s4636_s7 = inlined_call_operand.vmem [shape: f32[64,32], index: 7, kind: input, shape index: {}]   ;;  %s4637_s8 = inlined_call_operand.vmem [shape: f32[8,64], index: 8, kind: input, shape index: {}]   ;;  %s4638_s9 = inlined_call_operand.hbm [shape: f32[1,128], index: 9, kind: output, shape index: {}]  }
   0x1   :  { %v110_v0 = vld [vmem:[%s4633_s4] sm:$0xff]  ;;  %v111_v1 = vld [vmem:[%s4633_s4 + $0x8] sm:$0xff] }
   0x2   :  { %v106_v2 = vld [vmem:[%s4629_s0] sm:$0xff]  ;;  %v3505_v3 = vpack.c.bf16 %v111_v1, %v110_v0 }
   0x3   :  { %3069 = vmatprep.mubr.msk.f32.mxu0 %vm116_vm0, %v106_v2 }
   0x4   :  { %14 = vsyncpa [#allocation3], 0  ;;  %3506 = vmatprep.subr.bf16.mxu0 %v3505_v3  ;;  %v107_v4 = vld [vmem:[%s4629_s0 + $0x8] sm:$0xff]  ;;  %v108_v5 = vld [vmem:[%s4629_s0 + $0x10] sm:$0xff]  ;;  %vm286_vm1 = vcmask 261120   ;;  %v112_v8 = vlaneseq  ;;  %v3804_v49 = vmov 0  }
   0x5   :  { %3508 = vmatpush3.bf16.msra.mxu0 %v3505_v3  ;;  %v109_v6 = vld [vmem:[%s4629_s0 + $0x18] sm:$0xff]  ;;  %v3878_v7 = vld [vmem:[%s4631_s2] sm:$0xff]  ;;  %v3906_v23 = vld [vmem:[%s4631_s2 + $0x8] sm:$0xff]  ;;  %3777 = vset.pattern.permute.xlu0 %v3804_v49  ;;  %vm758_vm2 = vcmask 523264   ;;  %s3806_s30 = smov [#allocation2]  }
   0x6   :  { %3083 = vmatprep.mubr.msk.f32.mxu1 %vm286_vm1, %v3878_v7  ;;  %v3882_v9 = vshrl.u32 %v112_v8, 7  ;;  %v3888_v11 = vld [vmem:[%s4637_s8] sm:$0xff]  ;;  %v3911_v24 = vld [vmem:[%s4631_s2 + $0x10] sm:$0xff]  ;;  %v3920_v25 = vld [vmem:[%s4631_s2 + $0x18] sm:$0xff]  ;;  %3778 = vset.pattern.permute.xlu1 %v3804_v49  ;;  %s2667_s10 = sshll.u32 %s3806_s30, 4  ;;  %s2668_s10 = int_to_ptr.vmem [resolvable:$true] %s2667_s10 }
   0x7   :  { %v3925_v26 = vld [vmem:[%s4631_s2 + $0x20] sm:$0xff]  ;;  %v3934_v27 = vld [vmem:[%s4631_s2 + $0x28] sm:$0xff]  ;;  %v3939_v28 = vld [vmem:[%s4631_s2 + $0x30] sm:$0xff]  ;;  %s3780_s11 = scalar_lea.vmem %s2668_s10, 16  ;;  %s3784_s12 = scalar_lea.vmem %s2668_s10, 32 }
   0x8   :  { %3070 = vmatmul.mubr.msk.f32.vlgmr.msra.gmra.mrb[0].mxu0 %vm116_vm0, %v107_v4  ;;  %v114_v10 = vsub.s32 0, %v3882_v9  ;;  %v3948_v29 = vld [vmem:[%s4631_s2 + $0x38] sm:$0xff]  ;;  %v3953_v30 = vld [vmem:[%s4631_s2 + $0x40] sm:$0xff]  ;;  %v3962_v31 = vld [vmem:[%s4631_s2 + $0x48] sm:$0xff]  ;;  %p3781_p0 = scmp.ne.s32.totalorder %s2668_s10, %s3780_s11  ;;  %p3785_p1 = scmp.lt.s32.totalorder %s2668_s10, %s2668_s10 }
   0x9   :  { %3072 = vmatprep.mubr.msk.f32.mxu0 %vm116_vm0, %v108_v5  ;;  %v3967_v32 = vld [vmem:[%s4631_s2 + $0x50] sm:$0xff]  ;;  %v3976_v33 = vld [vmem:[%s4631_s2 + $0x58] sm:$0xff]  ;;  %v3981_v34 = vld [vmem:[%s4631_s2 + $0x60] sm:$0xff]  ;;  %p3786_p2 = scmp.lt.s32.totalorder %s3784_s12, %s3780_s11 }
   0xa   :  { %v115_v12 = vrot.slane %v3888_v11, %v114_v10  ;;  %v3990_v35 = vld [vmem:[%s4631_s2 + $0x68] sm:$0xff]  ;;  %v3995_v36 = vld [vmem:[%s4631_s2 + $0x70] sm:$0xff]  ;;  %v4004_v37 = vld [vmem:[%s4631_s2 + $0x78] sm:$0xff] }
   0xb   :  { %v37_v38 = vld [vmem:[%s4634_s5 + $0x20] sm:$0xff]  ;;  %v38_v39 = vld [vmem:[%s4634_s5 + $0x28] sm:$0xff]  ;;  %v39_v41 = vld [vmem:[%s4634_s5 + $0x30] sm:$0xff]  ;;  %p3787_p3 = por %p3786_p2, %p3785_p1 }
   0xc   :  { %3073 = vmatmul.mubr.msk.f32.gmra.mrb[2].mxu0 %vm116_vm0, %v109_v6  ;;  %v4014_v40 = vpack.c.bf16 %v38_v39, %v37_v38  ;;  %v40_v42 = vld [vmem:[%s4634_s5 + $0x38] sm:$0xff]  ;;  %v33_v44 = vld [vmem:[%s4634_s5] sm:$0xff]  ;;  %v34_v45 = vld [vmem:[%s4634_s5 + $0x8] sm:$0xff] }
   0xd   :  { %v4024_v43 = vpack.c.bf16 %v40_v42, %v39_v41  ;;  %v4034_v46 = vpack.c.bf16 %v34_v45, %v33_v44  ;;  %v214_v47 = vld [vmem:[%s4630_s1] sm:$0xff]  ;;  %v216_v48 = vld [vmem:[%s4630_s1 + $0x10] sm:$0xff]  ;;  %v215_v50 = vld [vmem:[%s4630_s1 + $0x8] sm:$0xff]  ;;  %p3788_p4 = pnand %p3787_p3, %p3781_p0 }
   0xe   :  { %3518 = vmatprep.subr.bf16.mxu0 %v4014_v40  ;;  %224 = vperm.xlu0 %3777, %v214_v47   ;;  %v217_v51 = vld [vmem:[%s4630_s1 + $0x18] sm:$0xff]  ;;  %v49_v52 = vld [vmem:[%s4635_s6] sm:$0xff]  ;;  %v50_v53 = vld [vmem:[%s4635_s6 + $0x8] sm:$0xff] }
   0xf   :  { %3520 = vmatpush3.bf16.msra.mxu0 %v4014_v40  ;;  %234 = vperm.xlu1 %3778, %v216_v48   ;;  %v51_v54 = vld [vmem:[%s4635_s6 + $0x10] sm:$0xff]  ;;  %v52_v55 = vld [vmem:[%s4635_s6 + $0x18] sm:$0xff]  ;;  %v4061_v56 = vpack.c.bf16 %v50_v53, %v49_v52  ;;  %v218_v58 = vld [vmem:[%s4630_s1 + $0x20] sm:$0xff] }
  0x10   :  { %3522 = vmatprep.subr.bf16.mxu0 %v4024_v43  ;;  %v4063_v57 = vpack.c.bf16 %v52_v55, %v51_v54  ;;  %v219_v59 = vld [vmem:[%s4630_s1 + $0x28] sm:$0xff]  ;;  %v53_v60 = vld [vmem:[%s4635_s6 + $0x20] sm:$0xff]  ;;  %v220_v62 = vld [vmem:[%s4630_s1 + $0x30] sm:$0xff] }
  0x11   :  { %v54_v61 = vld [vmem:[%s4635_s6 + $0x28] sm:$0xff]  ;;  %v221_v63 = vld [vmem:[%s4630_s1 + $0x38] sm:$0xff]  ;;  %v55_v1 = vld [vmem:[%s4635_s6 + $0x30] sm:$0xff] }
  0x12   :  { %229 = vperm.xlu0 %3777, %v215_v50   ;;  %v4086_v0 = vpack.c.bf16 %v54_v61, %v53_v60  ;;  %v56_v2 = vld [vmem:[%s4635_s6 + $0x38] sm:$0xff]  ;;  %v98_v48 = vld [vmem:[%s4632_s3] sm:$0xff]  ;;  %v99_v49 = vld [vmem:[%s4632_s3 + $0x8] sm:$0xff]  ;;  %v264_v60 = vsub.s32 1, %v3882_v9  ;;  %v276_v61 = vsub.s32 2, %v3882_v9 }
  0x13   :  { %3524 = vmatpush3.bf16.msra.mxu0 %v4024_v43  ;;  %239 = vperm.xlu1 %3778, %v217_v51   ;;  %v4096_v3 = vpack.c.bf16 %v56_v2, %v55_v1  ;;  %v100_v50 = vld [vmem:[%s4632_s3 + $0x10] sm:$0xff]  ;;  %v101_v51 = vld [vmem:[%s4632_s3 + $0x18] sm:$0xff]  ;;  %v102_v52 = vld [vmem:[%s4632_s3 + $0x20] sm:$0xff] }
  0x14   :  { %3526 = vmatprep.subr.bf16.mxu0 %v4034_v46  ;;  %v103_v53 = vld [vmem:[%s4632_s3 + $0x28] sm:$0xff]  ;;  %v104_v54 = vld [vmem:[%s4632_s3 + $0x30] sm:$0xff]  ;;  %v105_v55 = vld [vmem:[%s4632_s3 + $0x38] sm:$0xff]  ;;  %v277_v2 = vrot.slane %v3888_v11, %v276_v61 }
  0x16   :  { %244 = vperm.xlu0 %3777, %v218_v58  }
  0x17   :  { %249 = vperm.xlu1 %3778, %v219_v59  }
  0x1a   :  { %254 = vperm.xlu0 %3777, %v220_v62   ;;  %v265_v62 = vrot.slane %v3888_v11, %v264_v60 }
  0x1b   :  { %259 = vperm.xlu1 %3778, %v221_v63  }
  0x38   :  { %888 = vxpose.xlu0.b32.start [1/8] (short) (narrow) %v98_v48, 64 }
  0x3c   :  { %889 = vxpose.xlu0.b32.cont [2/8] (short) (narrow) %v99_v49, 64 }
  0x40   :  { %890 = vxpose.xlu0.b32.cont [3/8] (short) (narrow) %v100_v50, 64 }
  0x44   :  { %891 = vxpose.xlu0.b32.cont [4/8] (short) (narrow) %v101_v51, 64 }
  0x48   :  { %892 = vxpose.xlu0.b32.cont [5/8] (short) (narrow) %v102_v52, 64 }
  0x4c   :  { %893 = vxpose.xlu0.b32.cont [6/8] (short) (narrow) %v103_v53, 64 }
  0x50   :  { %894 = vxpose.xlu0.b32.cont [7/8] (short) (narrow) %v104_v54, 64 }
  0x54   :  { %895 = vxpose.xlu0.b32.end [8/8] (short) (narrow) %v105_v55, 64 }
  0x8d   :  { %v225_v59 = vpop.permute.xlu0 %224 }
  0x8e   :  { %v235_v58 = vpop.permute.xlu1 %234 }
  0x91   :  { %v230_v1 = vpop.permute.xlu0 %229 }
  0x92   :  { %v240_v63 = vpop.permute.xlu1 %239 }
  0xdb   :  { %v3071_v13 = vpop.f32.mrb[0].mxu0 }
  0xdc   :  { %v3891_v14 = vadd.f32 %v3071_v13, %v115_v12  ;;  %v195_v15 = vpop.f32.mrb[1].mxu0 }
  0xdd   :  { %v3893_v16 = vadd.f32 %v195_v15, %v115_v12 }
  0xdf   :  { %v3074_v17 = vpop.f32.mrb[2].mxu0  ;;  %v3509_v18 = vpack.c.bf16 %v3891_v14, %v3893_v16 }
  0xe0   :  { %v3897_v19 = vadd.f32 %v3074_v17, %v115_v12  ;;  %v205_v20 = vpop.f32.mrb[3].mxu0  ;;  %v35_v17 = vld [vmem:[%s4634_s5 + $0x10] sm:$0xff] }
  0xe1   :  { %v3899_v21 = vadd.f32 %v205_v20, %v115_v12  ;;  %3510 = vmatprep.subr.bf16.mxu1 %v3509_v18 }
  0xe2   :  { %3512 = vmatpush3.bf16.msra.mxu1 %v3509_v18  ;;  %v36_v18 = vld [vmem:[%s4634_s5 + $0x18] sm:$0xff] }
  0xe3   :  { %v3513_v22 = vpack.c.bf16 %v3897_v19, %v3899_v21  ;;  %v4107_v38 = vpack.c.bf16 %v36_v18, %v35_v17 }
  0xe5   :  { %3514 = vmatprep.subr.bf16.mxu1 %v3513_v22 }
  0xe6   :  { %3516 = vmatpush3.bf16.msra.mxu1 %v3513_v22 }
  0xe7   :  { %3534 = vmatprep.subr.bf16.mxu1 %v4061_v56 }
  0xe9   :  { %3084 = vmatmul.mubr.msk.f32.vlgmr.msra.gmra.mrb[0].mxu1 %vm286_vm1, %v3906_v23 }
  0xea   :  { %3086 = vmatprep.mubr.msk.f32.mxu1 %vm286_vm1, %v3911_v24  ;;  %3536 = vmatpush3.bf16.msra.mxu1 %v4061_v56 }
  0xeb   :  { %3538 = vmatprep.subr.bf16.mxu1 %v4063_v57 }
  0xed   :  { %3087 = vmatmul.mubr.msk.f32.gmra.mrb[2].mxu1 %vm286_vm1, %v3920_v25 }
  0xee   :  { %3089 = vmatprep.mubr.msk.f32.mxu1 %vm286_vm1, %v3925_v26  ;;  %3540 = vmatpush3.bf16.msra.mxu1 %v4063_v57 }
  0xef   :  { %3542 = vmatprep.subr.bf16.mxu1 %v4086_v0 }
  0xf1   :  { %3090 = vmatmul.mubr.msk.f32.gmra.mrb[4].mxu1 %vm286_vm1, %v3934_v27 }
  0xf2   :  { %3092 = vmatprep.mubr.msk.f32.mxu1 %vm286_vm1, %v3939_v28  ;;  %3544 = vmatpush3.bf16.msra.mxu1 %v4086_v0 }
  0xf3   :  { %3546 = vmatprep.subr.bf16.mxu1 %v4096_v3 }
  0xf5   :  { %3093 = vmatmul.mubr.msk.f32.gmra.mrb[6].mxu1 %vm286_vm1, %v3948_v29 }
  0xf6   :  { %3095 = vmatprep.mubr.msk.f32.mxu1 %vm286_vm1, %v3953_v30  ;;  %3548 = vmatpush3.bf16.msra.mxu1 %v4096_v3 }
  0xf9   :  { %3096 = vmatmul.mubr.msk.f32.gmra.mrb[8].mxu1 %vm286_vm1, %v3962_v31 }
  0xfa   :  { %3098 = vmatprep.mubr.msk.f32.mxu1 %vm286_vm1, %v3967_v32 }
  0xfd   :  { %3099 = vmatmul.mubr.msk.f32.gmra.mrb[10].mxu1 %vm286_vm1, %v3976_v33 }
  0xfe   :  { %3101 = vmatprep.mubr.msk.f32.mxu1 %vm286_vm1, %v3981_v34 }
 0x101   :  { %3102 = vmatmul.mubr.msk.f32.gmra.mrb[12].mxu1 %vm286_vm1, %v3990_v35 }
 0x102   :  { %3104 = vmatprep.mubr.msk.f32.mxu1 %vm286_vm1, %v3995_v36 }
 0x105   :  { %3105 = vmatmul.mubr.msk.f32.gmra.mrb[14].mxu1 %vm286_vm1, %v4004_v37 }
 0x1bc   :  { %v3085_v4 = vpop.f32.mrb[0].mxu1 }
 0x1bd   :  { %v401_v5 = vpop.f32.mrb[1].mxu1 }
 0x1c0   :  { %v3088_v6 = vpop.f32.mrb[2].mxu1 }
 0x1c1   :  { %v411_v8 = vpop.f32.mrb[3].mxu1 }
 0x1c4   :  { %v3091_v10 = vpop.f32.mrb[4].mxu1 }
 0x1c5   :  { %v421_v12 = vpop.f32.mrb[5].mxu1 }
 0x1c8   :  { %v3094_v13 = vpop.f32.mrb[6].mxu1 }
 0x1c9   :  { %v431_v15 = vpop.f32.mrb[7].mxu1 }
 0x1cc   :  { %v3097_v20 = vpop.f32.mrb[8].mxu1 }
 0x1cd   :  { %v441_v22 = vpop.f32.mrb[9].mxu1 }
 0x1ce   :  { %3115 = vmatprep.mubr.msk.f32.mxu0 %vm286_vm1, %v441_v22 }
 0x1cf   :  { %3116 = vmatmul.mubr.msk.f32.vlgmr.msra.gmra.mrb[4].mxu0 %vm286_vm1, %v3097_v20 }
 0x1d0   :  { %v3100_v39 = vpop.f32.mrb[10].mxu1  ;;  %3528 = vmatpush3.bf16.msra.mxu0 %v4034_v46 }
 0x1d1   :  { %v451_v41 = vpop.f32.mrb[11].mxu1  ;;  %3530 = vmatprep.subr.bf16.mxu0 %v4107_v38 }
 0x1d2   :  { %3118 = vmatprep.mubr.msk.f32.mxu0 %vm286_vm1, %v451_v41 }
 0x1d3   :  { %3119 = vmatmul.mubr.msk.f32.gmra.mrb[6].mxu0 %vm286_vm1, %v3100_v39 }
 0x1d4   :  { %v3103_v42 = vpop.f32.mrb[12].mxu1  ;;  %3532 = vmatpush3.bf16.msra.mxu0 %v4107_v38 }
 0x1d5   :  { %v461_v44 = vpop.f32.mrb[13].mxu1 }
 0x1d6   :  { %3121 = vmatprep.mubr.msk.f32.mxu0 %vm286_vm1, %v461_v44 }
 0x1d7   :  { %3122 = vmatmul.mubr.msk.f32.gmra.mrb[8].mxu0 %vm286_vm1, %v3103_v42 }
 0x1d8   :  { %v3106_v45 = vpop.f32.mrb[14].mxu1 }
 0x1d9   :  { %v471_v47 = vpop.f32.mrb[15].mxu1 }
 0x1da   :  { %3124 = vmatprep.mubr.msk.f32.mxu0 %vm286_vm1, %v471_v47 }
 0x1db   :  { %3125 = vmatmul.mubr.msk.f32.gmra.mrb[10].mxu0 %vm286_vm1, %v3106_v45 }
 0x1dc   :  { %3135 = vmatprep.mubr.msk.f32.mxu0 %vm286_vm1, %v401_v5  ;;  %v266_v5 = vmul.f32 %v265_v62, %v225_v59 }
 0x1de   :  { %v4158_v17 = vadd.f32 %v277_v2, %v266_v5 }
 0x1df   :  { %3136 = vmatmul.mubr.msk.f32.vlgmr.msra.gmra.mrb[4].mxu0 %vm286_vm1, %v3085_v4  ;;  %v267_v4 = vmul.f32 %v265_v62, %v230_v1 }
 0x1e0   :  { %3138 = vmatprep.mubr.msk.f32.mxu0 %vm286_vm1, %v411_v8  ;;  %v269_v8 = vmul.f32 %v265_v62, %v240_v63 }
 0x1e2   :  { %v4162_v41 = vadd.f32 %v277_v2, %v269_v8 }
 0x1e3   :  { %3139 = vmatmul.mubr.msk.f32.gmra.mrb[6].mxu0 %vm286_vm1, %v3088_v6  ;;  %v250_v6 = vpop.permute.xlu1 %249 }
 0x1e4   :  { %3141 = vmatprep.mubr.msk.f32.mxu0 %vm286_vm1, %v421_v12  ;;  %v4156_v12 = vadd.f32 %v277_v2, %v267_v4  ;;  %v271_v39 = vmul.f32 %v265_v62, %v250_v6 }
 0x1e6   :  { %v4170_v55 = vadd.f32 %v277_v2, %v271_v39 }
 0x1e7   :  { %3142 = vmatmul.mubr.msk.f32.gmra.mrb[8].mxu0 %vm286_vm1, %v3091_v10  ;;  %v245_v10 = vpop.permute.xlu0 %244  ;;  %v260_v44 = vpop.permute.xlu1 %259 }
 0x1e8   :  { %3144 = vmatprep.mubr.msk.f32.mxu0 %vm286_vm1, %v431_v15  ;;  %v270_v42 = vmul.f32 %v265_v62, %v245_v10  ;;  %v273_v54 = vmul.f32 %v265_v62, %v260_v44  ;;  %v58_v44 = vld [vmem:[%s4635_s6 + $0x48] sm:$0xff] }
 0x1ea   :  { %v4172_v61 = vadd.f32 %v277_v2, %v270_v42  ;;  %v4178_v6 = vadd.f32 %v277_v2, %v273_v54  ;;  %v63_v54 = vld [vmem:[%s4635_s6 + $0x70] sm:$0xff] }
 0x1eb   :  { %3145 = vmatmul.mubr.msk.f32.gmra.mrb[10].mxu0 %vm286_vm1, %v3094_v13  ;;  %v268_v13 = vmul.f32 %v265_v62, %v235_v58  ;;  %v255_v49 = vpop.permute.xlu0 %254 }
 0x1ec   :  { %v272_v58 = vmul.f32 %v265_v62, %v255_v49  ;;  %v60_v49 = vld [vmem:[%s4635_s6 + $0x58] sm:$0xff] }
 0x1ed   :  { %v4164_v48 = vadd.f32 %v277_v2, %v268_v13 }
 0x1ee   :  { %v4180_v13 = vadd.f32 %v277_v2, %v272_v58  ;;  %v57_v2 = vld [vmem:[%s4635_s6 + $0x40] sm:$0xff]  ;;  %v64_v58 = vld [vmem:[%s4635_s6 + $0x78] sm:$0xff] }
 0x1ef   :  { %v4188_v42 = vpop.trf.xlu0 }
 0x1f0   :  { %3191 = vmatprep.mubr.msk.f32.mxu0 %vm758_vm2, %v4188_v42 }
 0x2b2   :  { %v3137_v15 = vpop.f32.mrb[4].mxu0 }
 0x2b3   :  { %v739_v18 = vadd.f32 %v3137_v15, %v4156_v12  ;;  %v699_v20 = vpop.f32.mrb[5].mxu0 }
 0x2b4   :  { %v738_v22 = vadd.f32 %v699_v20, %v4158_v17 }
 0x2b5   :  { %v747_v50 = vmax.f32 %v739_v18, 0.0 }
 0x2b6   :  { %v746_v45 = vmax.f32 %v738_v22, 0.0  ;;  %v3140_v47 = vpop.f32.mrb[6].mxu0 }
 0x2b7   :  { %v741_v51 = vadd.f32 %v3140_v47, %v4162_v41  ;;  %v709_v52 = vpop.f32.mrb[7].mxu0  ;;  %v4201_v47 = vpack.c.bf16 %v58_v44, %v57_v2 }
 0x2b8   :  { %v740_v53 = vadd.f32 %v709_v52, %v4164_v48  ;;  %3163 = vmatprep.mubr.msk.f32.mxu1 %vm758_vm2, %v746_v45  ;;  %v59_v45 = vld [vmem:[%s4635_s6 + $0x50] sm:$0xff]  ;;  %v62_v52 = vld [vmem:[%s4635_s6 + $0x68] sm:$0xff] }
 0x2b9   :  { %3164 = vmatmul.mubr.msk.f32.vlgmr.msra.gmra.mrb[16].mxu1 %vm758_vm2, %v747_v50  ;;  %v749_v63 = vmax.f32 %v741_v51, 0.0  ;;  %v4206_v50 = vpack.c.bf16 %v60_v49, %v59_v45  ;;  %v61_v51 = vld [vmem:[%s4635_s6 + $0x60] sm:$0xff]  ;;  %3566 = vmatprep.subr.bf16.mxu1 %v4201_v47 }
 0x2ba   :  { %v748_v59 = vmax.f32 %v740_v53, 0.0  ;;  %v3143_v60 = vpop.f32.mrb[8].mxu0  ;;  %3568 = vmatpush3.bf16.msra.mxu1 %v4201_v47  ;;  %v4217_v53 = vpack.c.bf16 %v62_v52, %v61_v51 }
 0x2bb   :  { %v743_v1 = vadd.f32 %v3143_v60, %v4170_v55  ;;  %v719_v4 = vpop.f32.mrb[9].mxu0  ;;  %3570 = vmatprep.subr.bf16.mxu1 %v4206_v50  ;;  %v756_v60 = vsub.s32 3, %v3882_v9 }
 0x2bc   :  { %v742_v5 = vadd.f32 %v719_v4, %v4172_v61  ;;  %3166 = vmatprep.mubr.msk.f32.mxu1 %vm758_vm2, %v748_v59  ;;  %v4227_v59 = vpack.c.bf16 %v64_v58, %v63_v54 }
 0x2bd   :  { %3167 = vmatmul.mubr.msk.f32.gmra.mrb[18].mxu1 %vm758_vm2, %v749_v63  ;;  %v751_v62 = vmax.f32 %v743_v1, 0.0  ;;  %v4234_v63 = vrot.slane %v3888_v11, %v756_v60  ;;  %v4236_v1 = vpop.trf.xlu0 }
 0x2be   :  { %v750_v8 = vmax.f32 %v742_v5, 0.0  ;;  %v3146_v10 = vpop.f32.mrb[10].mxu0  ;;  %3572 = vmatpush3.bf16.msra.mxu1 %v4206_v50 }
 0x2bf   :  { %v745_v15 = vadd.f32 %v3146_v10, %v4178_v6  ;;  %v729_v18 = vpop.f32.mrb[11].mxu0  ;;  %3574 = vmatprep.subr.bf16.mxu1 %v4217_v53 }
 0x2c0   :  { %v744_v20 = vadd.f32 %v729_v18, %v4180_v13  ;;  %3169 = vmatprep.mubr.msk.f32.mxu1 %vm758_vm2, %v750_v8 }
 0x2c1   :  { %3170 = vmatmul.mubr.msk.f32.gmra.mrb[20].mxu1 %vm758_vm2, %v751_v62  ;;  %v753_v39 = vmax.f32 %v745_v15, 0.0  ;;  %v4240_v62 = vpop.trf.xlu0 }
 0x2c2   :  { %v752_v22 = vmax.f32 %v744_v20, 0.0  ;;  %3576 = vmatpush3.bf16.msra.mxu1 %v4217_v53 }
 0x2c3   :  { %3578 = vmatprep.subr.bf16.mxu1 %v4227_v59 }
 0x2c4   :  { %3172 = vmatprep.mubr.msk.f32.mxu1 %vm758_vm2, %v752_v22 }
 0x2c5   :  { %3173 = vmatmul.mubr.msk.f32.gmra.mrb[22].mxu1 %vm758_vm2, %v753_v39  ;;  %v4245_v51 = vpop.trf.xlu0 }
 0x2c6   :  { %3580 = vmatpush3.bf16.msra.mxu1 %v4227_v59 }
 0x38c   :  { %v3165_v4 = vpop.f32.mrb[16].mxu1 }
 0x38d   :  { %v855_v5 = vadd.f32 %v3165_v4, %v4234_v63  ;;  %v849_v8 = vpop.f32.mrb[17].mxu1 }
 0x38e   :  { %v850_v10 = vadd.f32 %v849_v8, %v4234_v63 }
 0x390   :  { %v3549_v15 = vpack.c.bf16 %v855_v5, %v850_v10  ;;  %v3168_v18 = vpop.f32.mrb[18].mxu1  ;;  %v4249_v5 = vpop.trf.xlu0 }
 0x391   :  { %v865_v20 = vadd.f32 %v3168_v18, %v4234_v63  ;;  %v859_v22 = vpop.f32.mrb[19].mxu1 }
 0x392   :  { %v860_v39 = vadd.f32 %v859_v22, %v4234_v63  ;;  %3550 = vmatprep.subr.bf16.mxu0 %v3549_v15  ;;  %v41_v22 = vld [vmem:[%s4634_s5 + $0x40] sm:$0xff] }
 0x393   :  { %3552 = vmatpush3.bf16.msra.mxu0 %v3549_v15 }
 0x394   :  { %v3553_v2 = vpack.c.bf16 %v865_v20, %v860_v39  ;;  %v3171_v44 = vpop.f32.mrb[20].mxu1  ;;  %v4252_v15 = vpop.trf.xlu0  ;;  %v42_v39 = vld [vmem:[%s4634_s5 + $0x48] sm:$0xff] }
 0x395   :  { %v875_v45 = vadd.f32 %v3171_v44, %v4234_v63  ;;  %v869_v49 = vpop.f32.mrb[21].mxu1  ;;  %v73_v44 = vld [vmem:[%s4636_s7] sm:$0xff] }
 0x396   :  { %v870_v52 = vadd.f32 %v869_v49, %v4234_v63  ;;  %3554 = vmatprep.subr.bf16.mxu0 %v3553_v2  ;;  %v75_v49 = vld [vmem:[%s4636_s7 + $0x10] sm:$0xff] }
 0x397   :  { %3556 = vmatpush3.bf16.msra.mxu0 %v3553_v2  ;;  %v4278_v2 = vpack.c.bf16 %v42_v39, %v41_v22  ;;  %v44_v22 = vld [vmem:[%s4634_s5 + $0x58] sm:$0xff] }
 0x398   :  { %v3557_v54 = vpack.c.bf16 %v875_v45, %v870_v52  ;;  %v3174_v58 = vpop.f32.mrb[22].mxu1  ;;  %v4258_v18 = vpop.trf.xlu0  ;;  %v74_v45 = vld [vmem:[%s4636_s7 + $0x8] sm:$0xff] }
 0x399   :  { %v885_v60 = vadd.f32 %v3174_v58, %v4234_v63  ;;  %v879_v4 = vpop.f32.mrb[23].mxu1  ;;  %4653 = vst [vmem:[#allocation5_spill] sm:$0xff] %v4258_v18  ;;  %3582 = vmatprep.subr.bf16.mxu1 %v4278_v2  ;;  %v4290_v52 = vpack.c.bf16 %v74_v45, %v73_v44 }
 0x39a   :  { %v880_v8 = vadd.f32 %v879_v4, %v4234_v63  ;;  %3558 = vmatprep.subr.bf16.mxu0 %v3557_v54  ;;  %v78_v4 = vld [vmem:[%s4636_s7 + $0x28] sm:$0xff] }
 0x39b   :  { %3560 = vmatpush3.bf16.msra.mxu0 %v3557_v54  ;;  %v76_v54 = vld [vmem:[%s4636_s7 + $0x18] sm:$0xff] }
 0x39c   :  { %v3561_v10 = vpack.c.bf16 %v885_v60, %v880_v8  ;;  %v4268_v20 = vpop.trf.xlu0  ;;  %v4295_v58 = vpack.c.bf16 %v76_v54, %v75_v49  ;;  %v77_v60 = vld [vmem:[%s4636_s7 + $0x20] sm:$0xff]  ;;  %v66_v54 = vld [vmem:[%s4635_s6 + $0x88] sm:$0xff] }
 0x39d   :  { %4654 = vst [vmem:[#allocation6_spill] sm:$0xff] %v4268_v20  ;;  %v4306_v8 = vpack.c.bf16 %v78_v4, %v77_v60  ;;  %v65_v49 = vld [vmem:[%s4635_s6 + $0x80] sm:$0xff] }
 0x39e   :  { %3562 = vmatprep.subr.bf16.mxu0 %v3561_v10 }
 0x39f   :  { %3564 = vmatpush3.bf16.msra.mxu0 %v3561_v10  ;;  %v43_v10 = vld [vmem:[%s4634_s5 + $0x50] sm:$0xff] }
 0x3a0   :  { %3606 = vmatprep.subr.bf16.mxu0 %v4290_v52  ;;  %v4317_v45 = vpack.c.bf16 %v44_v22, %v43_v10  ;;  %v4329_v10 = vpack.c.bf16 %v66_v54, %v65_v49  ;;  %v67_v22 = vld [vmem:[%s4635_s6 + $0x90] sm:$0xff] }
 0x3a2   :  { %3192 = vmatmul.mubr.msk.f32.vlgmr.msra.gmra.mrb[12].mxu0 %vm758_vm2, %v4236_v1  ;;  %4655 = vst [vmem:[#allocation7_spill] sm:$0xff] %v4317_v45  ;;  %4656 = vst [vmem:[#allocation8_spill] sm:$0xff] %v4329_v10 }
 0x3a3   :  { %3194 = vmatprep.mubr.msk.f32.mxu0 %vm758_vm2, %v4240_v62  ;;  %3608 = vmatpush3.bf16.msra.mxu0 %v4290_v52 }
 0x3a4   :  { %3610 = vmatprep.subr.bf16.mxu0 %v4295_v58 }
 0x3a6   :  { %3195 = vmatmul.mubr.msk.f32.gmra.mrb[14].mxu0 %vm758_vm2, %v4245_v51 }
 0x3a7   :  { %3197 = vmatprep.mubr.msk.f32.mxu0 %vm758_vm2, %v4249_v5  ;;  %3612 = vmatpush3.bf16.msra.mxu0 %v4295_v58 }
 0x3a8   :  { %3614 = vmatprep.subr.bf16.mxu0 %v4306_v8 }
 0x3aa   :  { %3198 = vmatmul.mubr.msk.f32.gmra.mrb[16].mxu0 %vm758_vm2, %v4252_v15 }
 0x3ab   :  { %3200 = vmatprep.mubr.msk.f32.mxu0 %vm758_vm2, %v4258_v18  ;;  %3616 = vmatpush3.bf16.msra.mxu0 %v4306_v8  ;;  %v72_v18 = vld [vmem:[%s4635_s6 + $0xb8] sm:$0xff] }
 0x3ae   :  { %3201 = vmatmul.mubr.msk.f32.gmra.mrb[18].mxu0 %vm758_vm2, %v4268_v20  ;;  %v70_v20 = vld [vmem:[%s4635_s6 + $0xa8] sm:$0xff] }
 0x475   :  { %v3193_v39 = vpop.f32.mrb[12].mxu0 }
 0x476   :  { %v1010_v44 = vpop.f32.mrb[13].mxu0 }
 0x477   :  { %3219 = vmatprep.mubr.msk.f32.mxu1 %vm758_vm2, %v1010_v44  ;;  %v68_v44 = vld [vmem:[%s4635_s6 + $0x98] sm:$0xff] }
 0x478   :  { %3220 = vmatmul.mubr.msk.f32.vlgmr.msra.gmra.mrb[24].mxu1 %vm758_vm2, %v3193_v39  ;;  %v4343_v49 = vpack.c.bf16 %v68_v44, %v67_v22 }
 0x479   :  { %3584 = vmatpush3.bf16.msra.mxu1 %v4278_v2  ;;  %v3196_v60 = vpop.f32.mrb[14].mxu0 }
 0x47a   :  { %v1020_v4 = vpop.f32.mrb[15].mxu0  ;;  %3586 = vmatprep.subr.bf16.mxu1 %v4317_v45  ;;  %4657 = vst [vmem:[#allocation9_spill] sm:$0xff] %v4343_v49 }
 0x47b   :  { %3222 = vmatprep.mubr.msk.f32.mxu1 %vm758_vm2, %v1020_v4  ;;  %v69_v4 = vld [vmem:[%s4635_s6 + $0xa0] sm:$0xff] }
 0x47c   :  { %3223 = vmatmul.mubr.msk.f32.gmra.mrb[26].mxu1 %vm758_vm2, %v3196_v60  ;;  %v4357_v22 = vpack.c.bf16 %v70_v20, %v69_v4 }
 0x47d   :  { %3588 = vmatpush3.bf16.msra.mxu1 %v4317_v45  ;;  %3233 = vmatprep.mubr.msk.f32.mxu1 %vm286_vm1, %v3893_v16  ;;  %v3199_v39 = vpop.f32.mrb[16].mxu0  ;;  %v71_v45 = vld [vmem:[%s4635_s6 + $0xb0] sm:$0xff] }
 0x47e   :  { %3590 = vmatprep.subr.bf16.mxu1 %v4329_v10  ;;  %v1030_v54 = vpop.f32.mrb[17].mxu0  ;;  %4658 = vst [vmem:[#allocation10_spill] sm:$0xff] %v4357_v22  ;;  %v4370_v20 = vpack.c.bf16 %v72_v18, %v71_v45  ;;  %v79_v18 = vld [vmem:[%s4636_s7 + $0x30] sm:$0xff]  ;;  %v80_v45 = vld [vmem:[%s4636_s7 + $0x38] sm:$0xff] }
 0x480   :  { %3234 = vmatmul.mubr.msk.f32.vlgmr.msra.gmra.mrb[24].mxu1 %vm286_vm1, %v3891_v14  ;;  %4659 = vst [vmem:[#allocation11_spill] sm:$0xff] %v4370_v20 }
 0x481   :  { %3592 = vmatpush3.bf16.msra.mxu1 %v4329_v10  ;;  %3236 = vmatprep.mubr.msk.f32.mxu1 %vm286_vm1, %v3899_v21  ;;  %v3202_v60 = vpop.f32.mrb[18].mxu0 }
 0x482   :  { %3594 = vmatprep.subr.bf16.mxu1 %v4343_v49  ;;  %v1040_v44 = vpop.f32.mrb[19].mxu0 }
 0x484   :  { %3237 = vmatmul.mubr.msk.f32.gmra.mrb[26].mxu1 %vm286_vm1, %v3897_v19 }
 0x485   :  { %3596 = vmatpush3.bf16.msra.mxu1 %v4343_v49  ;;  %3255 = vmatprep.mubr.msk.f32.mxu1 %vm758_vm2, %v1030_v54 }
 0x486   :  { %3598 = vmatprep.subr.bf16.mxu1 %v4357_v22 }
 0x489   :  { %3600 = vmatpush3.bf16.msra.mxu1 %v4357_v22 }
 0x48a   :  { %3602 = vmatprep.subr.bf16.mxu1 %v4370_v20 }
 0x48d   :  { %3604 = vmatpush3.bf16.msra.mxu1 %v4370_v20 }
 0x48e   :  { %3630 = vmatprep.subr.bf16.mxu1 %v4014_v40 }
 0x490   :  { %3256 = vmatmul.mubr.msk.f32.vlgmr.msra.gmra.mrb[24].mxu1 %vm758_vm2, %v3199_v39  ;;  %v4389_v39 = vpack.c.bf16 %v80_v45, %v79_v18 }
 0x491   :  { %3258 = vmatprep.mubr.msk.f32.mxu1 %vm758_vm2, %v1040_v44  ;;  %3632 = vmatpush3.bf16.msra.mxu1 %v4014_v40  ;;  %v1346_v40 = vsub.s32 4, %v3882_v9 }
 0x492   :  { %3634 = vmatprep.subr.bf16.mxu1 %v4024_v43  ;;  %4660 = vst [vmem:[#allocation12_spill] sm:$0xff] %v4389_v39  ;;  %3618 = vmatprep.subr.bf16.mxu0 %v4389_v39 }
 0x493   :  { %3620 = vmatpush3.bf16.msra.mxu0 %v4389_v39 }
 0x494   :  { %3259 = vmatmul.mubr.msk.f32.gmra.mrb[26].mxu1 %vm758_vm2, %v3202_v60 }
 0x495   :  { %3636 = vmatpush3.bf16.msra.mxu1 %v4024_v43  ;;  %v4395_v43 = vrot.slane %v3888_v11, %v1346_v40 }
 0x496   :  { %3638 = vmatprep.subr.bf16.mxu1 %v4034_v46 }
 0x563   :  { %v3257_v54 = vpop.f32.mrb[24].mxu1 }
 0x564   :  { %v1349_v4 = vadd.f32 %v3257_v54, %v4395_v43  ;;  %v1321_v60 = vpop.f32.mrb[25].mxu1  ;;  %v1459_v54 = vsub.s32 5, %v3882_v9 }
 0x565   :  { %v1348_v44 = vadd.f32 %v4395_v43, %v1321_v60 }
 0x566   :  { %v1353_v49 = vmax.f32 %v1349_v4, 0.0 }
 0x567   :  { %v1352_v20 = vmax.f32 %v1348_v44, 0.0  ;;  %v3260_v22 = vpop.f32.mrb[26].mxu1 }
 0x568   :  { %v1351_v18 = vadd.f32 %v3260_v22, %v4395_v43  ;;  %v1331_v45 = vpop.f32.mrb[27].mxu1  ;;  %v4409_v22 = vrot.slane %v3888_v11, %v1459_v54 }
 0x569   :  { %v1350_v10 = vadd.f32 %v4395_v43, %v1331_v45  ;;  %3277 = vmatprep.mubr.msk.f32.mxu0 %vm758_vm2, %v1352_v20 }
 0x56a   :  { %3278 = vmatmul.mubr.msk.f32.vlgmr.msra.gmra.mrb[20].mxu0 %vm758_vm2, %v1353_v49  ;;  %v1355_v39 = vmax.f32 %v1351_v18, 0.0 }
 0x56b   :  { %v1354_v40 = vmax.f32 %v1350_v10, 0.0 }
 0x56d   :  { %3280 = vmatprep.mubr.msk.f32.mxu0 %vm758_vm2, %v1354_v40 }
 0x56e   :  { %3281 = vmatmul.mubr.msk.f32.gmra.mrb[22].mxu0 %vm758_vm2, %v1355_v39 }
 0x56f   :  { %3291 = vmatprep.mubr.msk.f32.mxu0 %vm286_vm1, %v3878_v7 }
 0x63d   :  { %v3279_v4 = vpop.f32.mrb[20].mxu0 }
 0x63e   :  { %v1454_v60 = vadd.f32 %v3279_v4, %v3891_v14  ;;  %v1434_v20 = vpop.f32.mrb[21].mxu0 }
 0x63f   :  { %v1453_v49 = vadd.f32 %v1434_v20, %v3893_v16 }
 0x640   :  { %v4414_v10 = vadd.f32 %v4409_v22, %v1454_v60 }
 0x641   :  { %v4417_v44 = vadd.f32 %v4409_v22, %v1453_v49  ;;  %v3282_v39 = vpop.f32.mrb[22].mxu0 }
 0x642   :  { %v1456_v7 = vadd.f32 %v3282_v39, %v3897_v19  ;;  %v1444_v18 = vpop.f32.mrb[23].mxu0 }
 0x643   :  { %v1455_v45 = vadd.f32 %v1444_v18, %v3899_v21  ;;  %v3621_v11 = vpack.c.bf16 %v4414_v10, %v4417_v44 }
 0x644   :  { %v4424_v14 = vadd.f32 %v4409_v22, %v1456_v7 }
 0x645   :  { %v4427_v16 = vadd.f32 %v4409_v22, %v1455_v45  ;;  %3622 = vmatprep.subr.bf16.mxu0 %v3621_v11 }
 0x646   :  { %3624 = vmatpush3.bf16.msra.mxu0 %v3621_v11 }
 0x647   :  { %v3625_v40 = vpack.c.bf16 %v4424_v14, %v4427_v16 }
 0x649   :  { %3626 = vmatprep.subr.bf16.mxu0 %v3625_v40 }
 0x64a   :  { %3628 = vmatpush3.bf16.msra.mxu0 %v3625_v40 }
 0x64b   :  { %3646 = vmatprep.subr.bf16.mxu0 %v4061_v56 }
 0x64d   :  { %3292 = vmatmul.mubr.msk.f32.vlgmr.msra.gmra.mrb[24].mxu0 %vm286_vm1, %v3906_v23 }
 0x64e   :  { %3294 = vmatprep.mubr.msk.f32.mxu0 %vm286_vm1, %v3911_v24  ;;  %3648 = vmatpush3.bf16.msra.mxu0 %v4061_v56 }
 0x64f   :  { %3650 = vmatprep.subr.bf16.mxu0 %v4063_v57 }
 0x651   :  { %3295 = vmatmul.mubr.msk.f32.gmra.mrb[26].mxu0 %vm286_vm1, %v3920_v25 }
 0x652   :  { %3297 = vmatprep.mubr.msk.f32.mxu0 %vm286_vm1, %v3925_v26  ;;  %3652 = vmatpush3.bf16.msra.mxu0 %v4063_v57 }
 0x653   :  { %3654 = vmatprep.subr.bf16.mxu0 %v4086_v0 }
 0x655   :  { %3298 = vmatmul.mubr.msk.f32.gmra.mrb[28].mxu0 %vm286_vm1, %v3934_v27 }
 0x656   :  { %3300 = vmatprep.mubr.msk.f32.mxu0 %vm286_vm1, %v3939_v28  ;;  %3656 = vmatpush3.bf16.msra.mxu0 %v4086_v0 }
 0x657   :  { %3658 = vmatprep.subr.bf16.mxu0 %v4096_v3 }
 0x659   :  { %3301 = vmatmul.mubr.msk.f32.gmra.mrb[30].mxu0 %vm286_vm1, %v3948_v29 }
 0x65a   :  { %3303 = vmatprep.mubr.msk.f32.mxu0 %vm286_vm1, %v3953_v30  ;;  %3660 = vmatpush3.bf16.msra.mxu0 %v4096_v3 }
 0x65d   :  { %3304 = vmatmul.mubr.msk.f32.gmra.mrb[32].mxu0 %vm286_vm1, %v3962_v31 }
 0x65e   :  { %3306 = vmatprep.mubr.msk.f32.mxu0 %vm286_vm1, %v3967_v32 }
 0x661   :  { %3307 = vmatmul.mubr.msk.f32.gmra.mrb[34].mxu0 %vm286_vm1, %v3976_v33 }
 0x662   :  { %3309 = vmatprep.mubr.msk.f32.mxu0 %vm286_vm1, %v3981_v34 }
 0x665   :  { %3310 = vmatmul.mubr.msk.f32.gmra.mrb[36].mxu0 %vm286_vm1, %v3990_v35 }
 0x666   :  { %3312 = vmatprep.mubr.msk.f32.mxu0 %vm286_vm1, %v3995_v36 }
 0x669   :  { %3313 = vmatmul.mubr.msk.f32.gmra.mrb[38].mxu0 %vm286_vm1, %v4004_v37 }
 0x720   :  { %v3293_v19 = vpop.f32.mrb[24].mxu0 }
 0x721   :  { %v1531_v21 = vpop.f32.mrb[25].mxu0 }
 0x724   :  { %v3296_v23 = vpop.f32.mrb[26].mxu0 }
 0x725   :  { %v1541_v24 = vpop.f32.mrb[27].mxu0 }
 0x728   :  { %v3299_v25 = vpop.f32.mrb[28].mxu0 }
 0x729   :  { %v1551_v26 = vpop.f32.mrb[29].mxu0 }
 0x72c   :  { %v3302_v27 = vpop.f32.mrb[30].mxu0 }
 0x72d   :  { %v1561_v28 = vpop.f32.mrb[31].mxu0 }
 0x730   :  { %v3305_v29 = vpop.f32.mrb[32].mxu0 }
 0x731   :  { %v1571_v30 = vpop.f32.mrb[33].mxu0 }
 0x732   :  { %3323 = vmatprep.mubr.msk.f32.mxu1 %vm286_vm1, %v1571_v30 }
 0x733   :  { %3324 = vmatmul.mubr.msk.f32.vlgmr.msra.gmra.mrb[28].mxu1 %vm286_vm1, %v3305_v29 }
 0x734   :  { %v3308_v31 = vpop.f32.mrb[34].mxu0  ;;  %3640 = vmatpush3.bf16.msra.mxu1 %v4034_v46 }
 0x735   :  { %v1581_v32 = vpop.f32.mrb[35].mxu0  ;;  %3642 = vmatprep.subr.bf16.mxu1 %v4107_v38 }
 0x736   :  { %3326 = vmatprep.mubr.msk.f32.mxu1 %vm286_vm1, %v1581_v32 }
 0x737   :  { %3327 = vmatmul.mubr.msk.f32.gmra.mrb[30].mxu1 %vm286_vm1, %v3308_v31 }
 0x738   :  { %v3311_v33 = vpop.f32.mrb[36].mxu0  ;;  %3644 = vmatpush3.bf16.msra.mxu1 %v4107_v38 }
 0x739   :  { %v1591_v34 = vpop.f32.mrb[37].mxu0  ;;  %3678 = vmatprep.subr.bf16.mxu1 %v4201_v47 }
 0x73a   :  { %3329 = vmatprep.mubr.msk.f32.mxu1 %vm286_vm1, %v1591_v34 }
 0x73b   :  { %3330 = vmatmul.mubr.msk.f32.gmra.mrb[32].mxu1 %vm286_vm1, %v3311_v33 }
 0x73c   :  { %v3314_v35 = vpop.f32.mrb[38].mxu0 }
 0x73d   :  { %v1601_v36 = vpop.f32.mrb[39].mxu0 }
 0x73e   :  { %3332 = vmatprep.mubr.msk.f32.mxu1 %vm286_vm1, %v1601_v36 }
 0x73f   :  { %3333 = vmatmul.mubr.msk.f32.gmra.mrb[34].mxu1 %vm286_vm1, %v3314_v35  ;;  %v4665_v35 = vld [vmem:[#allocation8_spill] sm:$0xff] }
 0x740   :  { %3343 = vmatprep.mubr.msk.f32.mxu1 %vm286_vm1, %v1531_v21 }
 0x743   :  { %3344 = vmatmul.mubr.msk.f32.vlgmr.msra.gmra.mrb[28].mxu1 %vm286_vm1, %v3293_v19 }
 0x744   :  { %3346 = vmatprep.mubr.msk.f32.mxu1 %vm286_vm1, %v1541_v24  ;;  %3680 = vmatpush3.bf16.msra.mxu1 %v4201_v47 }
 0x745   :  { %3682 = vmatprep.subr.bf16.mxu1 %v4206_v50 }
 0x747   :  { %3347 = vmatmul.mubr.msk.f32.gmra.mrb[30].mxu1 %vm286_vm1, %v3296_v23 }
 0x748   :  { %3349 = vmatprep.mubr.msk.f32.mxu1 %vm286_vm1, %v1551_v26  ;;  %3684 = vmatpush3.bf16.msra.mxu1 %v4206_v50 }
 0x749   :  { %3686 = vmatprep.subr.bf16.mxu1 %v4217_v53 }
 0x74b   :  { %3350 = vmatmul.mubr.msk.f32.gmra.mrb[32].mxu1 %vm286_vm1, %v3299_v25 }
 0x74c   :  { %3352 = vmatprep.mubr.msk.f32.mxu1 %vm286_vm1, %v1561_v28  ;;  %3688 = vmatpush3.bf16.msra.mxu1 %v4217_v53 }
 0x74d   :  { %3690 = vmatprep.subr.bf16.mxu1 %v4227_v59 }
 0x74f   :  { %3353 = vmatmul.mubr.msk.f32.gmra.mrb[34].mxu1 %vm286_vm1, %v3302_v27 }
 0x750   :  { %3692 = vmatpush3.bf16.msra.mxu1 %v4227_v59 }
 0x751   :  { %3694 = vmatprep.subr.bf16.mxu1 %v4278_v2 }
 0x816   :  { %v3345_v37 = vpop.f32.mrb[28].mxu1 }
 0x817   :  { %v1869_v46 = vadd.f32 %v3345_v37, %v4156_v12  ;;  %v1829_v56 = vpop.f32.mrb[29].mxu1  ;;  %v4666_v37 = vld [vmem:[#allocation9_spill] sm:$0xff] }
 0x818   :  { %v1868_v57 = vadd.f32 %v1829_v56, %v4158_v17  ;;  %v4668_v56 = vld [vmem:[#allocation11_spill] sm:$0xff] }
 0x819   :  { %v1877_v38 = vmax.f32 %v1869_v46, 0.0  ;;  %v4667_v46 = vld [vmem:[#allocation10_spill] sm:$0xff] }
 0x81a   :  { %v1876_v0 = vmax.f32 %v1868_v57, 0.0  ;;  %v3348_v3 = vpop.f32.mrb[30].mxu1  ;;  %v45_v57 = vld [vmem:[%s4634_s5 + $0x60] sm:$0xff] }
 0x81b   :  { %v1871_v47 = vadd.f32 %v3348_v3, %v4162_v41  ;;  %v1839_v50 = vpop.f32.mrb[31].mxu1 }
 0x81c   :  { %v1870_v53 = vadd.f32 %v1839_v50, %v4164_v48  ;;  %3371 = vmatprep.mubr.msk.f32.mxu0 %vm758_vm2, %v1876_v0  ;;  %v46_v0 = vld [vmem:[%s4634_s5 + $0x68] sm:$0xff] }
 0x81d   :  { %3372 = vmatmul.mubr.msk.f32.vlgmr.msra.gmra.mrb[40].mxu0 %vm758_vm2, %v1877_v38  ;;  %v1879_v4 = vmax.f32 %v1871_v47, 0.0  ;;  %v3733_v3 = vpack.c.bf16 %v46_v0, %v45_v57 }
 0x81e   :  { %v1878_v59 = vmax.f32 %v1870_v53, 0.0  ;;  %v3351_v54 = vpop.f32.mrb[32].mxu1 }
 0x81f   :  { %v1873_v12 = vadd.f32 %v3351_v54, %v4170_v55  ;;  %v1849_v60 = vpop.f32.mrb[33].mxu1 }
 0x820   :  { %v1872_v17 = vadd.f32 %v1849_v60, %v4172_v61  ;;  %3374 = vmatprep.mubr.msk.f32.mxu0 %vm758_vm2, %v1878_v59 }
 0x821   :  { %3375 = vmatmul.mubr.msk.f32.gmra.mrb[42].mxu0 %vm758_vm2, %v1879_v4  ;;  %v1881_v49 = vmax.f32 %v1873_v12, 0.0 }
 0x822   :  { %v1880_v41 = vmax.f32 %v1872_v17, 0.0  ;;  %v3354_v20 = vpop.f32.mrb[34].mxu1 }
 0x823   :  { %v1875_v48 = vadd.f32 %v3354_v20, %v4178_v6  ;;  %v1859_v39 = vpop.f32.mrb[35].mxu1 }
 0x824   :  { %v1874_v7 = vadd.f32 %v1859_v39, %v4180_v13  ;;  %3377 = vmatprep.mubr.msk.f32.mxu0 %vm758_vm2, %v1880_v41 }
 0x825   :  { %3378 = vmatmul.mubr.msk.f32.gmra.mrb[44].mxu0 %vm758_vm2, %v1881_v49  ;;  %v1883_v18 = vmax.f32 %v1875_v48, 0.0  ;;  %v47_v49 = vld [vmem:[%s4634_s5 + $0x70] sm:$0xff]  ;;  %v48_v48 = vld [vmem:[%s4634_s5 + $0x78] sm:$0xff] }
 0x826   :  { %v1882_v55 = vmax.f32 %v1874_v7, 0.0 }
 0x828   :  { %3380 = vmatprep.mubr.msk.f32.mxu0 %vm758_vm2, %v1882_v55 }
 0x829   :  { %3381 = vmatmul.mubr.msk.f32.gmra.mrb[46].mxu0 %vm758_vm2, %v1883_v18 }
 0x82a   :  { %3399 = vmatprep.mubr.msk.f32.mxu0 %vm758_vm2, %v4188_v42 }
 0x8f0   :  { %v3373_v61 = vpop.f32.mrb[40].mxu0 }
 0x8f1   :  { %v1980_v45 = vadd.f32 %v3373_v61, %v4234_v63  ;;  %v1974_v6 = vpop.f32.mrb[41].mxu0 }
 0x8f2   :  { %v1975_v11 = vadd.f32 %v1974_v6, %v4234_v63 }
 0x8f4   :  { %v3661_v13 = vpack.c.bf16 %v1980_v45, %v1975_v11  ;;  %v3376_v40 = vpop.f32.mrb[42].mxu0 }
 0x8f5   :  { %v1990_v19 = vadd.f32 %v3376_v40, %v4234_v63  ;;  %v1984_v21 = vpop.f32.mrb[43].mxu0 }
 0x8f6   :  { %v1985_v23 = vadd.f32 %v1984_v21, %v4234_v63  ;;  %3662 = vmatprep.subr.bf16.mxu0 %v3661_v13 }
 0x8f7   :  { %3664 = vmatpush3.bf16.msra.mxu0 %v3661_v13 }
 0x8f8   :  { %v3665_v24 = vpack.c.bf16 %v1990_v19, %v1985_v23  ;;  %v3379_v25 = vpop.f32.mrb[44].mxu0 }
 0x8f9   :  { %v2000_v26 = vadd.f32 %v3379_v25, %v4234_v63  ;;  %v1994_v42 = vpop.f32.mrb[45].mxu0 }
 0x8fa   :  { %v1995_v27 = vadd.f32 %v1994_v42, %v4234_v63  ;;  %3666 = vmatprep.subr.bf16.mxu0 %v3665_v24 }
 0x8fb   :  { %3668 = vmatpush3.bf16.msra.mxu0 %v3665_v24 }
 0x8fc   :  { %v3669_v28 = vpack.c.bf16 %v2000_v26, %v1995_v27  ;;  %v3382_v29 = vpop.f32.mrb[46].mxu0 }
 0x8fd   :  { %v2010_v30 = vadd.f32 %v3382_v29, %v4234_v63  ;;  %v2004_v31 = vpop.f32.mrb[47].mxu0 }
 0x8fe   :  { %v2005_v32 = vadd.f32 %v2004_v31, %v4234_v63  ;;  %3670 = vmatprep.subr.bf16.mxu0 %v3669_v28  ;;  %v4661_v63 = vld [vmem:[#allocation5_spill] sm:$0xff] }
 0x8ff   :  { %3672 = vmatpush3.bf16.msra.mxu0 %v3669_v28 }
 0x900   :  { %v3673_v33 = vpack.c.bf16 %v2010_v30, %v2005_v32 }
 0x902   :  { %3674 = vmatprep.subr.bf16.mxu0 %v3673_v33 }
 0x903   :  { %3676 = vmatpush3.bf16.msra.mxu0 %v3673_v33 }
 0x904   :  { %3718 = vmatprep.subr.bf16.mxu0 %v4290_v52 }
 0x906   :  { %3400 = vmatmul.mubr.msk.f32.vlgmr.msra.gmra.mrb[48].mxu0 %vm758_vm2, %v4236_v1  ;;  %v4662_v1 = vld [vmem:[#allocation12_spill] sm:$0xff] }
 0x907   :  { %3402 = vmatprep.mubr.msk.f32.mxu0 %vm758_vm2, %v4240_v62  ;;  %3720 = vmatpush3.bf16.msra.mxu0 %v4290_v52  ;;  %v4663_v62 = vld [vmem:[#allocation6_spill] sm:$0xff] }
 0x908   :  { %3722 = vmatprep.subr.bf16.mxu0 %v4295_v58 }
 0x90a   :  { %3403 = vmatmul.mubr.msk.f32.gmra.mrb[50].mxu0 %vm758_vm2, %v4245_v51 }
 0x90b   :  { %3405 = vmatprep.mubr.msk.f32.mxu0 %vm758_vm2, %v4249_v5  ;;  %3724 = vmatpush3.bf16.msra.mxu0 %v4295_v58  ;;  %v4664_v58 = vld [vmem:[#allocation7_spill] sm:$0xff] }
 0x90c   :  { %3726 = vmatprep.subr.bf16.mxu0 %v4306_v8 }
 0x90e   :  { %3406 = vmatmul.mubr.msk.f32.gmra.mrb[52].mxu0 %vm758_vm2, %v4252_v15 }
 0x90f   :  { %3408 = vmatprep.mubr.msk.f32.mxu0 %vm758_vm2, %v4661_v63  ;;  %3728 = vmatpush3.bf16.msra.mxu0 %v4306_v8 }
 0x910   :  { %3730 = vmatprep.subr.bf16.mxu0 %v4662_v1 }
 0x912   :  { %3409 = vmatmul.mubr.msk.f32.gmra.mrb[54].mxu0 %vm758_vm2, %v4663_v62 }
 0x913   :  { %3732 = vmatpush3.bf16.msra.mxu0 %v4662_v1 }
 0x914   :  { %3734 = vmatprep.subr.bf16.mxu0 %v3733_v3 }
 0x9d9   :  { %v3401_v51 = vpop.f32.mrb[48].mxu0 }
 0x9da   :  { %v2079_v5 = vpop.f32.mrb[49].mxu0 }
 0x9db   :  { %3427 = vmatprep.mubr.msk.f32.mxu1 %vm758_vm2, %v2079_v5 }
 0x9dc   :  { %3428 = vmatmul.mubr.msk.f32.vlgmr.msra.gmra.mrb[36].mxu1 %vm758_vm2, %v3401_v51 }
 0x9dd   :  { %3696 = vmatpush3.bf16.msra.mxu1 %v4278_v2  ;;  %v3404_v15 = vpop.f32.mrb[50].mxu0 }
 0x9de   :  { %v2089_v52 = vpop.f32.mrb[51].mxu0  ;;  %3698 = vmatprep.subr.bf16.mxu1 %v4664_v58 }
 0x9df   :  { %3430 = vmatprep.mubr.msk.f32.mxu1 %vm758_vm2, %v2089_v52 }
 0x9e0   :  { %3431 = vmatmul.mubr.msk.f32.gmra.mrb[38].mxu1 %vm758_vm2, %v3404_v15 }
 0x9e1   :  { %3700 = vmatpush3.bf16.msra.mxu1 %v4664_v58  ;;  %v3407_v8 = vpop.f32.mrb[52].mxu0  ;;  %3441 = vmatprep.mubr.msk.f32.mxu1 %vm286_vm1, %v4417_v44 }
 0x9e2   :  { %v2099_v34 = vpop.f32.mrb[53].mxu0  ;;  %3702 = vmatprep.subr.bf16.mxu1 %v4665_v35 }
 0x9e4   :  { %3442 = vmatmul.mubr.msk.f32.vlgmr.msra.gmra.mrb[36].mxu1 %vm286_vm1, %v4414_v10 }
 0x9e5   :  { %3704 = vmatpush3.bf16.msra.mxu1 %v4665_v35  ;;  %v3410_v2 = vpop.f32.mrb[54].mxu0  ;;  %3444 = vmatprep.mubr.msk.f32.mxu1 %vm286_vm1, %v4427_v16 }
 0x9e6   :  { %v2109_v36 = vpop.f32.mrb[55].mxu0  ;;  %3706 = vmatprep.subr.bf16.mxu1 %v4666_v37 }
 0x9e8   :  { %3445 = vmatmul.mubr.msk.f32.gmra.mrb[38].mxu1 %vm286_vm1, %v4424_v14 }
 0x9e9   :  { %3708 = vmatpush3.bf16.msra.mxu1 %v4666_v37  ;;  %3463 = vmatprep.mubr.msk.f32.mxu1 %vm758_vm2, %v2099_v34 }
 0x9ea   :  { %3710 = vmatprep.subr.bf16.mxu1 %v4667_v46 }
 0x9ed   :  { %3712 = vmatpush3.bf16.msra.mxu1 %v4667_v46 }
 0x9ee   :  { %3714 = vmatprep.subr.bf16.mxu1 %v4668_v56 }
 0x9f1   :  { %3716 = vmatpush3.bf16.msra.mxu1 %v4668_v56 }
 0x9f4   :  { %3464 = vmatmul.mubr.msk.f32.vlgmr.msra.gmra.mrb[36].mxu1 %vm758_vm2, %v3407_v8 }
 0x9f5   :  { %3466 = vmatprep.mubr.msk.f32.mxu1 %vm758_vm2, %v2109_v36 }
 0x9f8   :  { %3467 = vmatmul.mubr.msk.f32.gmra.mrb[38].mxu1 %vm758_vm2, %v3410_v2 }
 0xac7   :  { %v3465_v38 = vpop.f32.mrb[36].mxu1 }
 0xac8   :  { %v2414_v47 = vadd.f32 %v3465_v38, %v4395_v43  ;;  %v2390_v50 = vpop.f32.mrb[37].mxu1 }
 0xac9   :  { %v2413_v53 = vadd.f32 %v2390_v50, %v4395_v43 }
 0xaca   :  { %v2418_v4 = vmax.f32 %v2414_v47, 0.0 }
 0xacb   :  { %v2417_v59 = vmax.f32 %v2413_v53, 0.0  ;;  %v3468_v54 = vpop.f32.mrb[38].mxu1 }
 0xacc   :  { %v2416_v12 = vadd.f32 %v3468_v54, %v4395_v43  ;;  %v2400_v60 = vpop.f32.mrb[39].mxu1 }
 0xacd   :  { %v2415_v17 = vadd.f32 %v2400_v60, %v4395_v43  ;;  %3485 = vmatprep.mubr.msk.f32.mxu0 %vm758_vm2, %v2417_v59  ;;  %v3737_v43 = vpack.c.bf16 %v48_v48, %v47_v49 }
 0xace   :  { %3486 = vmatmul.mubr.msk.f32.vlgmr.msra.gmra.mrb[56].mxu0 %vm758_vm2, %v2418_v4  ;;  %v2420_v20 = vmax.f32 %v2416_v12, 0.0 }
 0xacf   :  { %v2419_v41 = vmax.f32 %v2415_v17, 0.0  ;;  %3736 = vmatpush3.bf16.msra.mxu0 %v3733_v3 }
 0xad0   :  { %3738 = vmatprep.subr.bf16.mxu0 %v3737_v43 }
 0xad1   :  { %3488 = vmatprep.mubr.msk.f32.mxu0 %vm758_vm2, %v2419_v41 }
 0xad2   :  { %3489 = vmatmul.mubr.msk.f32.gmra.mrb[58].mxu0 %vm758_vm2, %v2420_v20 }
 0xad3   :  { %3740 = vmatpush3.bf16.msra.mxu0 %v3737_v43 }
 0xba1   :  { %v3487_v39 = vpop.f32.mrb[56].mxu0 }
 0xba2   :  { %v2519_v7 = vadd.f32 %v3487_v39, %v4414_v10  ;;  %v2499_v55 = vpop.f32.mrb[57].mxu0 }
 0xba3   :  { %v2518_v18 = vadd.f32 %v2499_v55, %v4417_v44  ;;  %v2528_v44 = vsub.s32 6, %v3882_v9 }
 0xba4   :  { %v2523_v6 = vadd.f32 %v2519_v7, %v4409_v22 }
 0xba5   :  { %v2522_v61 = vadd.f32 %v2518_v18, %v4409_v22  ;;  %v3490_v45 = vpop.f32.mrb[58].mxu0 }
 0xba6   :  { %v2521_v11 = vadd.f32 %v3490_v45, %v4424_v14  ;;  %v2509_v13 = vpop.f32.mrb[59].mxu0  ;;  %v3779_v14 = vld [vmem:[%s4637_s8] sm:$0xff]  ;;  %s3805_s8 = smov 64  }
 0xba7   :  { %v2520_v40 = vadd.f32 %v2509_v13, %v4427_v16  ;;  %3499 = vmatprep.mubr.msk.f32.mxu0 %vm286_vm1, %v2522_v61  ;;  %v2529_v21 = vrot.slane %v3779_v14, %v2528_v44 }
 0xba8   :  { %3500 = vmatmul.mubr.msk.f32.vlgmr.msra.gmra.mrb[60].mxu0 %vm286_vm1, %v2523_v6  ;;  %v2525_v10 = vadd.f32 %v2521_v11, %v4409_v22 }
 0xba9   :  { %v2524_v19 = vadd.f32 %v2520_v40, %v4409_v22 }
 0xbab   :  { %3502 = vmatprep.mubr.msk.f32.mxu0 %vm286_vm1, %v2524_v19 }
 0xbac   :  { %3503 = vmatmul.mubr.msk.f32.gmra.mrb[62].mxu0 %vm286_vm1, %v2525_v10 }
 0xc7b   :  { %v3501_v16 = vpop.f32.mrb[60].mxu0 }
 0xc7c   :  { %v2614_v23 = vadd.f32 %v3501_v16, %v2529_v21  ;;  %v2608_v24 = vpop.f32.mrb[61].mxu0 }
 0xc7d   :  { %v2609_v25 = vadd.f32 %v2608_v24, %v2529_v21 }
 0xc7e   :  { %v2628_v26 = vsel %vm758_vm2, %v2614_v23, -inf  ;;  %v2641_v42 = vsel %vm758_vm2, %v2614_v23, 0.0 }
 0xc7f   :  { %v2627_v22 = vsel %vm758_vm2, %v2609_v25, -inf  ;;  %v2640_v27 = vsel %vm758_vm2, %v2609_v25, 0.0  ;;  %v3504_v28 = vpop.f32.mrb[62].mxu0 }
 0xc80   :  { %v2631_v29 = vmax.f32 %v2627_v22, %v2628_v26  ;;  %v2642_v9 = vadd.f32 %v2641_v42, %v2640_v27  ;;  %v2624_v30 = vadd.f32 %v3504_v28, %v2529_v21  ;;  %v2618_v31 = vpop.f32.mrb[63].mxu0 }
 0xc81   :  { %v2619_v32 = vadd.f32 %v2618_v31, %v2529_v21 }
 0xc82   :  { %v2630_v33 = vsel %vm758_vm2, %v2624_v30, -inf  ;;  %v2645_v5 = vsel %vm758_vm2, %v2624_v30, 0.0 }
 0xc83   :  { %v2629_v63 = vsel %vm758_vm2, %v2619_v32, -inf  ;;  %v2643_v1 = vsel %vm758_vm2, %v2619_v32, 0.0 }
 0xc84   :  { %v2632_v62 = vmax.f32 %v2629_v63, %v2630_v33  ;;  %v2644_v51 = vadd.f32 %v2643_v1, %v2642_v9 }
 0xc86   :  { %v2633_v15 = vmax.f32 %v2631_v29, %v2632_v62  ;;  %v2646_v52 = vadd.f32 %v2645_v5, %v2644_v51 }
 0xc88   :  { %v2647_v58 = vrot.slane %v2646_v52, 4  ;;  %v2634_v46 = vrot.slane %v2633_v15, 4 }
 0xc8a   :  { %v2648_v8 = vadd.f32 %v2647_v58, %v2646_v52  ;;  %v2635_v56 = vmax.f32 %v2633_v15, %v2634_v46 }
 0xc8c   :  { %v2649_v34 = vrot.slane %v2648_v8, 2  ;;  %v2636_v57 = vrot.slane %v2635_v56, 2 }
 0xc8e   :  { %v2650_v35 = vadd.f32 %v2649_v34, %v2648_v8  ;;  %v2637_v0 = vmax.f32 %v2635_v56, %v2636_v57 }
 0xc90   :  { %v2651_v2 = vrot.slane %v2650_v35, 1  ;;  %v2638_v3 = vrot.slane %v2637_v0, 1 }
 0xc92   :  { %v2652_v36 = vadd.f32 %v2651_v2, %v2650_v35  ;;  %v2639_v38 = vmax.f32 %v2637_v0, %v2638_v3 }
 0xc94   :  { %v2654_v37 = vmul.f32 0.03125, %v2652_v36 }
 0xc96   :  { %2656 = vrot.lane.b32.xlu1 %v2654_v37, %s3805_s8 }
 0xd08   :  { %v2657_v47 = vpop.permute.xlu1 %2656 }
 0xd09   :  { %v2659_v50 = vsel %vm758_vm2, %v2639_v38, %v2657_v47 }
 0xd0a   :  { %2660 = vst [vmem:[#allocation2] sm:$0x1] %v2659_v50 }
 0xd0b   :  { %3791 = shalt.err (!%p3788_p4)
}
 0xd0c   :  { %s3792_s14 = scalar_lea.hbm %s4638_s9, 16 }
 0xd0d   :  { %p3793_p5 = scmp.ne.s32.totalorder %s4638_s9, %s3792_s14  ;;  %p3796_p6 = scmp.lt.u32.totalorder %s3792_s14, %s4638_s9 }
 0xd0f   :  { %p3798_p7 = pnand %p3796_p6, %p3793_p5 }
 0xd11   :  { %3801 = shalt.err (!%p3798_p7)
}
 0xd12   :  { %2670 = dma.vmem_to_hbm [thread:$0]  %s2668_s10, 16, %s4638_s9, [#allocation3]  }
 0xd13   :  { %3802 = dma.done.wait [#allocation3], 16  }
 0xd14   :  { %3803 = vsyncadd [#allocation3], 4294967280 }
 0xd15   :  { %2674 = vsyncpa [#allocation3], 1 }

</bundles_post_ra>
